<compile_context>
chip_gen: v7x
topology: tpu7x:2x2x1
jax: 0.10.0
libtpu: 0.0.40
codegen_flags: <defaults>
</compile_context>

<pallas_src>
import jax
import jax.numpy as jnp
from jax.experimental import pallas as pl
from jax.experimental.pallas import tpu as pltpu

F_IN = 784
H1 = 512
H2 = 32


def _round_up(x, m):
    return (x + m - 1) // m * m


def autoencoder_kernel(x_ref,
                       w1_ref, b1_ref,
                       w2_ref, b2_ref,
                       w3_ref, b3_ref,
                       w4_ref, b4_ref,
                       out_ref):
    # In-kernel bf16 cast of the f32 input tile (hidden under the MXU passes).
    x = x_ref[...].astype(jnp.bfloat16)                                 # (TB, 784)

    # enc1: 784 -> 512, relu   (bf16 MXU, f32 accumulate)
    h = jnp.dot(x, w1_ref[...], preferred_element_type=jnp.float32) + b1_ref[...]
    h = jnp.maximum(h, 0.0).astype(jnp.bfloat16)

    # enc2: 512 -> 32, relu   (tiny layer; MXU underfill hides under the big layers)
    h = jnp.dot(h, w2_ref[...], preferred_element_type=jnp.float32) + b2_ref[...]
    h = jnp.maximum(h, 0.0).astype(jnp.bfloat16)

    # dec1: 32 -> 512, relu
    h = jnp.dot(h, w3_ref[...], preferred_element_type=jnp.float32) + b3_ref[...]
    h = jnp.maximum(h, 0.0).astype(jnp.bfloat16)

    # dec2: 512 -> 784, sigmoid = 1 / (1 + exp(-h)): exp + approx reciprocal both on EUP
    h = jnp.dot(h, w4_ref[...], preferred_element_type=jnp.float32) + b4_ref[...]
    out_ref[...] = pl.reciprocal(1.0 + jnp.exp(-h), approx=True)


def prepare_params(params):
    """One-time device-side prep: cast weights to bf16 (MXU operands), keep biases f32.

    params: dict with w{i}: (in, out) f32 and b{i}: (1, out) f32, i in 1..4.
    Call once and reuse; autoencoder_forward does no per-call array rebuilding.
    """
    prepped = {}
    for i in range(1, 5):
        prepped[f"w{i}"] = params[f"w{i}"].astype(jnp.bfloat16)
        prepped[f"b{i}"] = params[f"b{i}"].astype(jnp.float32)
    return prepped


def _choose_batch_tile(B, batch_tile):
    # Keep >= 4 grid steps at small/medium B (>= 2 steps per TensorCore on v7x so the
    # x DMA and the 784-wide f32 writeback overlap compute on each core).
    TB = batch_tile
    if B < 4 * TB:
        TB = max(8, _round_up(pl.cdiv(B, 4), 8))
    return min(TB, batch_tile)


def autoencoder_forward(x, prepped, *, batch_tile=512):
    """x: (B, 784) float32. prepped: output of prepare_params()."""
    B, d_in = x.shape
    assert d_in == F_IN

    TB = _choose_batch_tile(B, batch_tile)
    grid = (pl.cdiv(B, TB),)

    def resident(arr):
        # Full-array block with a constant index_map: fetched once, resident in VMEM.
        return pl.BlockSpec(arr.shape, lambda i: (0,) * arr.ndim)

    w1, b1 = prepped["w1"], prepped["b1"]
    w2, b2 = prepped["w2"], prepped["b2"]
    w3, b3 = prepped["w3"], prepped["b3"]
    w4, b4 = prepped["w4"], prepped["b4"]

    out = pl.pallas_call(
        autoencoder_kernel,
        out_shape=jax.ShapeDtypeStruct((B, F_IN), jnp.float32),
        grid_spec=pltpu.PrefetchScalarGridSpec(
            num_scalar_prefetch=0,
            grid=grid,
            in_specs=[
                pl.BlockSpec((TB, F_IN), lambda i: (i, 0)),   # x tile (double-buffered)
                resident(w1), resident(b1),
                resident(w2), resident(b2),
                resident(w3), resident(b3),
                resident(w4), resident(b4),
            ],
            out_specs=pl.BlockSpec((TB, F_IN), lambda i: (i, 0)),
        ),
        compiler_params=pltpu.CompilerParams(
            dimension_semantics=("parallel",),
            vmem_limit_bytes=48 * 1024 * 1024,   # headroom for batch_tile up to 1024 on v7x
        ),
    )(x, w1, b1, w2, b2, w3, b3, w4, b4)

    return out   # (B, 784) f32 -- no padded columns, no wrapper slice pass


def init_params(key):
    """Deterministic init mimicking PyTorch nn.Linear default (uniform +/- 1/sqrt(fan_in)).
    Weights are stored transposed: shape (in_features, out_features)."""
    dims = [(F_IN, H1), (H1, H2), (H2, H1), (H1, F_IN)]
    params = {}
    keys = jax.random.split(key, 2 * len(dims))
    for idx, (fan_in, fan_out) in enumerate(dims):
        bound = 1.0 / jnp.sqrt(float(fan_in))
        wk, bk = keys[2 * idx], keys[2 * idx + 1]
        params[f"w{idx + 1}"] = jax.random.uniform(
            wk, (fan_in, fan_out), jnp.float32, -bound, bound)
        params[f"b{idx + 1}"] = jax.random.uniform(
            bk, (1, fan_out), jnp.float32, -bound, bound)
    return params


def reference_forward_bf16(x, params):
    """Precision-matched reference (bf16 matmul operands, f32 accumulate/activations)."""
    def lin(h, w, b):
        return jnp.dot(h.astype(jnp.bfloat16), w.astype(jnp.bfloat16),
                       preferred_element_type=jnp.float32) + b
    h = jnp.maximum(lin(x, params["w1"], params["b1"]), 0.0)
    h = jnp.maximum(lin(h, params["w2"], params["b2"]), 0.0)
    h = jnp.maximum(lin(h, params["w3"], params["b3"]), 0.0)
    return jax.nn.sigmoid(lin(h, params["w4"], params["b4"]))


def reference_forward_f32(x, params):
    h = jnp.maximum(x @ params["w1"] + params["b1"], 0.0)
    h = jnp.maximum(h @ params["w2"] + params["b2"], 0.0)
    h = jnp.maximum(h @ params["w3"] + params["b3"], 0.0)
    return jax.nn.sigmoid(h @ params["w4"] + params["b4"])


if __name__ == "__main__":
    key = jax.random.PRNGKey(0)
    pkey, xkey = jax.random.split(key)

    params = init_params(pkey)
    prepped = prepare_params(params)          # one-time bf16 cast, reused across calls

    # Small batch of flattened 28x28 "images" in [0, 1]. B=50 with the auto-chosen
    # 16-row tile gives a 4-step parallel grid and exercises the ragged last block
    # (out-of-bounds rows are never written back).
    B = 50
    x = jax.random.uniform(xkey, (B, F_IN), jnp.float32, 0.0, 1.0)

    out = jax.block_until_ready(autoencoder_forward(x, prepped))
    assert out.shape == (B, F_IN)
    assert out.dtype == jnp.float32

    # Precision-matched check (bf16 matmuls, f32 accumulate); tolerance covers the
    # EUP approximate-reciprocal sigmoid.
    ref_bf16 = reference_forward_bf16(x, params)
    max_err = float(jnp.max(jnp.abs(out - ref_bf16)))
    assert max_err < 3e-3, max_err

    # Loose sanity check against the full-f32 module semantics (bf16 rounding only).
    ref_f32 = reference_forward_f32(x, params)
    assert float(jnp.max(jnp.abs(out - ref_f32))) < 5e-2

    print("KERNEL_OK")
</pallas_src>

<mosaic_0001>
module attributes {stable_mosaic.version = 11 : i64} {
  func.func @autoencoder_kernel(%arg0: i32, %arg1: memref<16x784xf32, #tpu.memory_space<vmem>>, %arg2: memref<784x512xbf16, #tpu.memory_space<vmem>>, %arg3: memref<1x512xf32, #tpu.memory_space<vmem>>, %arg4: memref<512x32xbf16, #tpu.memory_space<vmem>>, %arg5: memref<1x32xf32, #tpu.memory_space<vmem>>, %arg6: memref<32x512xbf16, #tpu.memory_space<vmem>>, %arg7: memref<1x512xf32, #tpu.memory_space<vmem>>, %arg8: memref<512x784xbf16, #tpu.memory_space<vmem>>, %arg9: memref<1x784xf32, #tpu.memory_space<vmem>>, %arg10: memref<16x784xf32, #tpu.memory_space<vmem>>) attributes {dimension_semantics = [#tpu.dimension_semantics<parallel>], iteration_bounds = array<i64: 4>, scalar_prefetch = 0 : i64, scratch_operands = 0 : i64, tpu.core_type = #tpu.core_type<tc>, window_params = [{transform_indices = @transform_0, window_bounds = array<i64: 16, 784>}, {pipeline_mode = #tpu.pipeline_mode<synchronous>, transform_indices = @transform_1, window_bounds = array<i64: 784, 512>}, {pipeline_mode = #tpu.pipeline_mode<synchronous>, transform_indices = @transform_2, window_bounds = array<i64: 1, 512>}, {pipeline_mode = #tpu.pipeline_mode<synchronous>, transform_indices = @transform_3, window_bounds = array<i64: 512, 32>}, {pipeline_mode = #tpu.pipeline_mode<synchronous>, transform_indices = @transform_4, window_bounds = array<i64: 1, 32>}, {pipeline_mode = #tpu.pipeline_mode<synchronous>, transform_indices = @transform_5, window_bounds = array<i64: 32, 512>}, {pipeline_mode = #tpu.pipeline_mode<synchronous>, transform_indices = @transform_6, window_bounds = array<i64: 1, 512>}, {pipeline_mode = #tpu.pipeline_mode<synchronous>, transform_indices = @transform_7, window_bounds = array<i64: 512, 784>}, {pipeline_mode = #tpu.pipeline_mode<synchronous>, transform_indices = @transform_8, window_bounds = array<i64: 1, 784>}, {transform_indices = @transform_9, window_bounds = array<i64: 16, 784>}]} {
    %c0 = arith.constant 0 : index
    %c0_0 = arith.constant 0 : index
    %0 = vector.load %arg1[%c0, %c0_0] : memref<16x784xf32, #tpu.memory_space<vmem>>, vector<16x784xf32>
    %1 = arith.truncf %0 : vector<16x784xf32> to vector<16x784xbf16>
    %c0_1 = arith.constant 0 : index
    %c0_2 = arith.constant 0 : index
    %2 = vector.load %arg2[%c0_1, %c0_2] : memref<784x512xbf16, #tpu.memory_space<vmem>>, vector<784x512xbf16>
    %cst = arith.constant dense<0.000000e+00> : vector<16x512xf32>
    %3 = tpu.matmul %1, %2, %cst {dimension_numbers = #tpu.dot_dimension_numbers<[1], [0], [0], [1], [0, 0, 1, 1], [], []>} : vector<16x784xbf16>, vector<784x512xbf16>, vector<16x512xf32> -> vector<16x512xf32>
    %c0_3 = arith.constant 0 : index
    %c0_4 = arith.constant 0 : index
    %4 = vector.load %arg3[%c0_3, %c0_4] : memref<1x512xf32, #tpu.memory_space<vmem>>, vector<1x512xf32>
    %5 = vector.broadcast %4 : vector<1x512xf32> to vector<16x512xf32>
    %6 = arith.addf %3, %5 : vector<16x512xf32>
    %cst_5 = arith.constant 0.000000e+00 : f32
    %7 = vector.broadcast %cst_5 : f32 to vector<16x512xf32>
    %8 = arith.maximumf %6, %7 : vector<16x512xf32>
    %9 = arith.truncf %8 : vector<16x512xf32> to vector<16x512xbf16>
    %c0_6 = arith.constant 0 : index
    %c0_7 = arith.constant 0 : index
    %10 = vector.load %arg4[%c0_6, %c0_7] : memref<512x32xbf16, #tpu.memory_space<vmem>>, vector<512x32xbf16>
    %cst_8 = arith.constant dense<0.000000e+00> : vector<16x32xf32>
    %11 = tpu.matmul %9, %10, %cst_8 {dimension_numbers = #tpu.dot_dimension_numbers<[1], [0], [0], [1], [0, 0, 1, 1], [], []>} : vector<16x512xbf16>, vector<512x32xbf16>, vector<16x32xf32> -> vector<16x32xf32>
    %c0_9 = arith.constant 0 : index
    %c0_10 = arith.constant 0 : index
    %12 = vector.load %arg5[%c0_9, %c0_10] : memref<1x32xf32, #tpu.memory_space<vmem>>, vector<1x32xf32>
    %13 = vector.broadcast %12 : vector<1x32xf32> to vector<16x32xf32>
    %14 = arith.addf %11, %13 : vector<16x32xf32>
    %cst_11 = arith.constant 0.000000e+00 : f32
    %15 = vector.broadcast %cst_11 : f32 to vector<16x32xf32>
    %16 = arith.maximumf %14, %15 : vector<16x32xf32>
    %17 = arith.truncf %16 : vector<16x32xf32> to vector<16x32xbf16>
    %c0_12 = arith.constant 0 : index
    %c0_13 = arith.constant 0 : index
    %18 = vector.load %arg6[%c0_12, %c0_13] : memref<32x512xbf16, #tpu.memory_space<vmem>>, vector<32x512xbf16>
    %cst_14 = arith.constant dense<0.000000e+00> : vector<16x512xf32>
    %19 = tpu.matmul %17, %18, %cst_14 {dimension_numbers = #tpu.dot_dimension_numbers<[1], [0], [0], [1], [0, 0, 1, 1], [], []>} : vector<16x32xbf16>, vector<32x512xbf16>, vector<16x512xf32> -> vector<16x512xf32>
    %c0_15 = arith.constant 0 : index
    %c0_16 = arith.constant 0 : index
    %20 = vector.load %arg7[%c0_15, %c0_16] : memref<1x512xf32, #tpu.memory_space<vmem>>, vector<1x512xf32>
    %21 = vector.broadcast %20 : vector<1x512xf32> to vector<16x512xf32>
    %22 = arith.addf %19, %21 : vector<16x512xf32>
    %cst_17 = arith.constant 0.000000e+00 : f32
    %23 = vector.broadcast %cst_17 : f32 to vector<16x512xf32>
    %24 = arith.maximumf %22, %23 : vector<16x512xf32>
    %25 = arith.truncf %24 : vector<16x512xf32> to vector<16x512xbf16>
    %c0_18 = arith.constant 0 : index
    %c0_19 = arith.constant 0 : index
    %26 = vector.load %arg8[%c0_18, %c0_19] : memref<512x784xbf16, #tpu.memory_space<vmem>>, vector<512x784xbf16>
    %cst_20 = arith.constant dense<0.000000e+00> : vector<16x784xf32>
    %27 = tpu.matmul %25, %26, %cst_20 {dimension_numbers = #tpu.dot_dimension_numbers<[1], [0], [0], [1], [0, 0, 1, 1], [], []>} : vector<16x512xbf16>, vector<512x784xbf16>, vector<16x784xf32> -> vector<16x784xf32>
    %c0_21 = arith.constant 0 : index
    %c0_22 = arith.constant 0 : index
    %28 = vector.load %arg9[%c0_21, %c0_22] : memref<1x784xf32, #tpu.memory_space<vmem>>, vector<1x784xf32>
    %29 = vector.broadcast %28 : vector<1x784xf32> to vector<16x784xf32>
    %30 = arith.addf %27, %29 : vector<16x784xf32>
    %cst_23 = arith.constant 0.000000e+00 : f32
    %31 = vector.broadcast %cst_23 : f32 to vector<16x784xf32>
    %32 = arith.subf %31, %30 : vector<16x784xf32>
    %33 = math.exp %32 : vector<16x784xf32>
    %cst_24 = arith.constant 1.000000e+00 : f32
    %34 = vector.broadcast %cst_24 : f32 to vector<16x784xf32>
    %35 = arith.addf %34, %33 : vector<16x784xf32>
    %36 = tpu.reciprocal %35 {approx = true} : vector<16x784xf32> -> vector<16x784xf32>
    %c0_25 = arith.constant 0 : index
    %c0_26 = arith.constant 0 : index
    %37 = vector.load %arg10[%c0_25, %c0_26] : memref<16x784xf32, #tpu.memory_space<vmem>>, vector<16x784xf32>
    tpu.vector_store %arg10[%c0_25, %c0_26], %36 {strides = array<i32>} : memref<16x784xf32, #tpu.memory_space<vmem>>, vector<16x784xf32>,
    return
  }
  func.func @transform_0(%arg0: i32) -> (i32, i32) {
    %c0_i32 = arith.constant 0 : i32
    %c0_i32_0 = arith.constant 0 : i32
    return %arg0, %c0_i32 : i32, i32
  }
  func.func @transform_1(%arg0: i32) -> (i32, i32) {
    %c0_i32 = arith.constant 0 : i32
    %c0_i32_0 = arith.constant 0 : i32
    %c0_i32_1 = arith.constant 0 : i32
    return %c0_i32, %c0_i32_0 : i32, i32
  }
  func.func @transform_2(%arg0: i32) -> (i32, i32) {
    %c0_i32 = arith.constant 0 : i32
    %c0_i32_0 = arith.constant 0 : i32
    %c0_i32_1 = arith.constant 0 : i32
    return %c0_i32, %c0_i32_0 : i32, i32
  }
  func.func @transform_3(%arg0: i32) -> (i32, i32) {
    %c0_i32 = arith.constant 0 : i32
    %c0_i32_0 = arith.constant 0 : i32
    %c0_i32_1 = arith.constant 0 : i32
    return %c0_i32, %c0_i32_0 : i32, i32
  }
  func.func @transform_4(%arg0: i32) -> (i32, i32) {
    %c0_i32 = arith.constant 0 : i32
    %c0_i32_0 = arith.constant 0 : i32
    %c0_i32_1 = arith.constant 0 : i32
    return %c0_i32, %c0_i32_0 : i32, i32
  }
  func.func @transform_5(%arg0: i32) -> (i32, i32) {
    %c0_i32 = arith.constant 0 : i32
    %c0_i32_0 = arith.constant 0 : i32
    %c0_i32_1 = arith.constant 0 : i32
    return %c0_i32, %c0_i32_0 : i32, i32
  }
  func.func @transform_6(%arg0: i32) -> (i32, i32) {
    %c0_i32 = arith.constant 0 : i32
    %c0_i32_0 = arith.constant 0 : i32
    %c0_i32_1 = arith.constant 0 : i32
    return %c0_i32, %c0_i32_0 : i32, i32
  }
  func.func @transform_7(%arg0: i32) -> (i32, i32) {
    %c0_i32 = arith.constant 0 : i32
    %c0_i32_0 = arith.constant 0 : i32
    %c0_i32_1 = arith.constant 0 : i32
    return %c0_i32, %c0_i32_0 : i32, i32
  }
  func.func @transform_8(%arg0: i32) -> (i32, i32) {
    %c0_i32 = arith.constant 0 : i32
    %c0_i32_0 = arith.constant 0 : i32
    %c0_i32_1 = arith.constant 0 : i32
    return %c0_i32, %c0_i32_0 : i32, i32
  }
  func.func @transform_9(%arg0: i32) -> (i32, i32) {
    %c0_i32 = arith.constant 0 : i32
    %c0_i32_0 = arith.constant 0 : i32
    return %arg0, %c0_i32 : i32, i32
  }
}

</mosaic_0001>

<bundles_post_ra>
// kernel: tpu_custom_call.1
= control target key start
LH: loop header
LB: loop body
LE: loop exit
PB: predicated region body
PF: predicated region fallthrough
CT: control target
= control target key end

     0   :  { %14 = vsyncpa [#allocation3], 0  ;;  %s7536_s0 = inlined_call_operand.vmem [shape: f32[50,784], index: 0, kind: input, shape index: {}]   ;;  %s7537_s1 = inlined_call_operand.vmem [shape: bf16[784,512], index: 1, kind: input, shape index: {}]   ;;  %s7538_s2 = inlined_call_operand.vmem [shape: f32[1,512], index: 2, kind: input, shape index: {}]   ;;  %s7539_s3 = inlined_call_operand.vmem [shape: bf16[512,32], index: 3, kind: input, shape index: {}]   ;;  %s7540_s4 = inlined_call_operand.vmem [shape: f32[1,32], index: 4, kind: input, shape index: {}]   ;;  %s7541_s5 = inlined_call_operand.vmem [shape: bf16[32,512], index: 5, kind: input, shape index: {}]   ;;  %s7542_s6 = inlined_call_operand.vmem [shape: f32[1,512], index: 6, kind: input, shape index: {}]   ;;  %s7543_s7 = inlined_call_operand.vmem [shape: bf16[512,784], index: 7, kind: input, shape index: {}]   ;;  %s7544_s8 = inlined_call_operand.vmem [shape: f32[1,784], index: 8, kind: input, shape index: {}]   ;;  %s7545_s9 = inlined_call_operand.hbm [shape: f32[50,784], index: 9, kind: output, shape index: {}]  }
   0x1   :  { %16 = vsyncpa [#allocation3 + $0x1], 0  ;;  %s5920_s30 = smov 0   ;;  %s5922_s10 = smov 0  }
   0x2   :  { %s5924_s11 = smov 0   ;;  %s5926_s12 = smov 0  }
   0x3 LB: > { %s5941_s13 = sadd.s32 4294967295, %s5864_s12   ;;  %s4420_s14 = sadd.s32 4294967294, %s5864_s12   ;;  %s5864_s12 = sphi %s5926_s12, %s7553_s12   ;;  %s5860_s11 = sphi %s5924_s11, %s7552_s11   ;;  %s5856_s10 = sphi %s5922_s10, %s7551_s10   ;;  %s5852_s30 = sphi %s5920_s30, %s7550_s30  }
   0x4   : > { %s5945_s15 = sadd.s32 1, %s5864_s12   ;;  %s223_s16 = sadd.s32 1, %s5860_s11 }
   0x5   : > { %s220_s17 = ssub.s32 %s5864_s12, %s5945_s15  ;;  %p233_p0 = scmp.ne.s32.totalorder %s5860_s11, %s5856_s10 }
   0x6   : > { %p221_p1 = scmp.eq.s32.totalorder %s220_s17, 0  ;;  %p234_p2 = scmp.eq.s32.totalorder %s5941_s13, 3 }
   0x7   : > { %p239_p3 = scmp.ne.s32.totalorder %s5856_s10, %s5852_s30  ;;  %p240_p4 = scmp.eq.s32.totalorder %s4420_s14, 3 }
   0x8   : > { %s5956_s18 = scalar_select %p221_p1, %s5860_s11, %s223_s16  }
   0x9   : > { %p5958_p5 = por %p234_p2, %p233_p0  ;;  %p5962_p6 = por %p240_p4, %p239_p3 }
   0xa   : > { %7546 = sst [smem:[#allocation5_spill]] %s5956_s18  ;;  %p4423_p7 = scmp.ge.s32.totalorder %s5864_s12, 1 }
   0xb   : > { %p302_p8 = scmp.lt.s32.totalorder %s5864_s12, 5 }
   0xd   : > { %p303_p9 = pnand %p4423_p7, %p302_p8 }
   0xe   : > { %v5088_v0 = vld [vmem:[%s7537_s1 + $0x4] ss:$16 sps:$4 sm:$0xff] (!%p303_p9)   ;;  %v5090_v1 = vld [vmem:[%s7537_s1 + $0xc] ss:$16 sps:$4 sm:$0xff] (!%p303_p9)   ;;  %v5092_v2 = vld [vmem:[%s7537_s1] ss:$16 sps:$4 sm:$0xff] (!%p303_p9)  }
   0xf   : > { %306 = sbr.rel (%p303_p9) target bundleno = 1385 (0x569), region = 56  ;;  %1591 = vmatprep.subr.bf16.mxu0 (!%p303_p9), %v5088_v0  ;;  %v5093_v3 = vld [vmem:[%s7537_s1 + $0x8] ss:$16 sps:$4 sm:$0xff] (!%p303_p9)   ;;  %1763 = vmatprep.subr.bf16.mxu1 (!%p303_p9), %v5090_v1  ;;  %v5094_v4 = vld [vmem:[%s7537_s1 + $0x24] ss:$16 sps:$4 sm:$0xff] (!%p303_p9)   ;;  %s6056_s16 = sshll.u32 (!%p303_p9), %s5941_s13, 1 }
  0x10   : > { %1592 = vmatpush1.bf16.msra.mxu0 (!%p303_p9), %v5092_v2  ;;  %1764 = vmatpush1.bf16.msra.mxu1 (!%p303_p9), %v5093_v3  ;;  %v5096_v5 = vld [vmem:[%s7537_s1 + $0x2c] ss:$16 sps:$4 sm:$0xff] (!%p303_p9)   ;;  %v5098_v6 = vld [vmem:[%s7537_s1 + $0x20] ss:$16 sps:$4 sm:$0xff] (!%p303_p9)   ;;  %v5099_v7 = vld [vmem:[%s7537_s1 + $0x28] ss:$16 sps:$4 sm:$0xff] (!%p303_p9)  }
  0x11   : > { %1593 = vmatprep.subr.bf16.mxu0 (!%p303_p9), %v5094_v4  ;;  %1765 = vmatprep.subr.bf16.mxu1 (!%p303_p9), %v5096_v5  ;;  %v5100_v8 = vld [vmem:[%s7537_s1 + $0x44] ss:$16 sps:$4 sm:$0xff] (!%p303_p9)   ;;  %v5102_v9 = vld [vmem:[%s7537_s1 + $0x4c] ss:$16 sps:$4 sm:$0xff] (!%p303_p9)   ;;  %v5104_v10 = vld [vmem:[%s7537_s1 + $0x40] ss:$16 sps:$4 sm:$0xff] (!%p303_p9)  }
  0x12   : > { %v5105_v11 = vld [vmem:[%s7537_s1 + $0x48] ss:$16 sps:$4 sm:$0xff] (!%p303_p9)   ;;  %v5106_v12 = vld [vmem:[%s7537_s1 + $0x64] ss:$16 sps:$4 sm:$0xff] (!%p303_p9)   ;;  %v5108_v13 = vld [vmem:[%s7537_s1 + $0x6c] ss:$16 sps:$4 sm:$0xff] (!%p303_p9)  }
  0x13   : > { %v5110_v14 = vld [vmem:[%s7537_s1 + $0x60] ss:$16 sps:$4 sm:$0xff] (!%p303_p9)   ;;  %v5111_v15 = vld [vmem:[%s7537_s1 + $0x68] ss:$16 sps:$4 sm:$0xff] (!%p303_p9)   ;;  %v5112_v16 = vld [vmem:[%s7537_s1 + $0x84] ss:$16 sps:$4 sm:$0xff] (!%p303_p9)  }
  0x14   : > { %1594 = vmatpush1.bf16.msra.mxu0 (!%p303_p9), %v5098_v6  ;;  %1766 = vmatpush1.bf16.msra.mxu1 (!%p303_p9), %v5099_v7  ;;  %v5114_v17 = vld [vmem:[%s7537_s1 + $0x8c] ss:$16 sps:$4 sm:$0xff] (!%p303_p9)   ;;  %v5116_v18 = vld [vmem:[%s7537_s1 + $0x80] ss:$16 sps:$4 sm:$0xff] (!%p303_p9)   ;;  %v5117_v19 = vld [vmem:[%s7537_s1 + $0x88] ss:$16 sps:$4 sm:$0xff] (!%p303_p9)  }
  0x15   : > { %1595 = vmatprep.subr.bf16.mxu0 (!%p303_p9), %v5100_v8  ;;  %1767 = vmatprep.subr.bf16.mxu1 (!%p303_p9), %v5102_v9  ;;  %v5118_v20 = vld [vmem:[%s7537_s1 + $0xa4] ss:$16 sps:$4 sm:$0xff] (!%p303_p9)   ;;  %v5120_v21 = vld [vmem:[%s7537_s1 + $0xac] ss:$16 sps:$4 sm:$0xff] (!%p303_p9)   ;;  %v5122_v22 = vld [vmem:[%s7537_s1 + $0xa0] ss:$16 sps:$4 sm:$0xff] (!%p303_p9)  }
  0x16   : > { %v5123_v23 = vld [vmem:[%s7537_s1 + $0xa8] ss:$16 sps:$4 sm:$0xff]   ;;  %v5124_v24 = vld [vmem:[%s7537_s1 + $0xc4] ss:$16 sps:$4 sm:$0xff]   ;;  %v5126_v25 = vld [vmem:[%s7537_s1 + $0xcc] ss:$16 sps:$4 sm:$0xff]  }
  0x17   : > { %v5128_v26 = vld [vmem:[%s7537_s1 + $0xc0] ss:$16 sps:$4 sm:$0xff]   ;;  %v5129_v27 = vld [vmem:[%s7537_s1 + $0xc8] ss:$16 sps:$4 sm:$0xff]   ;;  %v5130_v28 = vld [vmem:[%s7537_s1 + $0xe4] ss:$16 sps:$4 sm:$0xff]  }
  0x18   : > { %1596 = vmatpush1.bf16.msra.mxu0 %v5104_v10  ;;  %1768 = vmatpush1.bf16.msra.mxu1 %v5105_v11  ;;  %v5132_v29 = vld [vmem:[%s7537_s1 + $0xec] ss:$16 sps:$4 sm:$0xff]   ;;  %v5134_v30 = vld [vmem:[%s7537_s1 + $0xe0] ss:$16 sps:$4 sm:$0xff]   ;;  %p350_p10 = scmp.lt.s32.totalorder %s6056_s16, 6  ;;  %vm1587_vm0 = vcmask 130048  }
  0x19   : > { %1597 = vmatprep.subr.bf16.mxu0 %v5106_v12  ;;  %1769 = vmatprep.subr.bf16.mxu1 %v5108_v13  ;;  %v5135_v31 = vld [vmem:[%s7537_s1 + $0xe8] ss:$16 sps:$4 sm:$0xff]   ;;  %v5136_v32 = vld [vmem:[%s7537_s1 + $0x104] ss:$16 sps:$4 sm:$0xff]   ;;  %v5138_v33 = vld [vmem:[%s7537_s1 + $0x10c] ss:$16 sps:$4 sm:$0xff]  }
  0x1a   : > { %v5140_v34 = vld [vmem:[%s7537_s1 + $0x100] ss:$16 sps:$4 sm:$0xff]   ;;  %v5141_v35 = vld [vmem:[%s7537_s1 + $0x108] ss:$16 sps:$4 sm:$0xff]   ;;  %s351_s23 = scalar_select %p350_p10, %s6056_s16, 6  ;;  %vm2365_vm1 = vcmask 261120  }
  0x1b   : > { %v5142_v36 = vld [vmem:[%s7537_s1 + $0x124] ss:$16 sps:$4 sm:$0xff]   ;;  %v5144_v37 = vld [vmem:[%s7537_s1 + $0x12c] ss:$16 sps:$4 sm:$0xff]   ;;  %v5146_v38 = vld [vmem:[%s7537_s1 + $0x120] ss:$16 sps:$4 sm:$0xff]  }
  0x1c   : > { %1598 = vmatpush1.bf16.msra.mxu0 %v5110_v14  ;;  %1770 = vmatpush1.bf16.msra.mxu1 %v5111_v15  ;;  %s5045_s14 = smul.u32 56, %s351_s23  ;;  %v5147_v39 = vld [vmem:[%s7537_s1 + $0x128] ss:$16 sps:$4 sm:$0xff]   ;;  %v5148_v40 = vld [vmem:[%s7537_s1 + $0x144] ss:$16 sps:$4 sm:$0xff]   ;;  %s341_s27 = sand.u32 1, %s5856_s10  }
  0x1d   : > { %1599 = vmatprep.subr.bf16.mxu0 %v5112_v16  ;;  %1771 = vmatprep.subr.bf16.mxu1 %v5114_v17  ;;  %v5150_v41 = vld [vmem:[%s7537_s1 + $0x14c] ss:$16 sps:$4 sm:$0xff]   ;;  %v5152_v42 = vld [vmem:[%s7537_s1 + $0x140] ss:$16 sps:$4 sm:$0xff]   ;;  %v5153_v43 = vld [vmem:[%s7537_s1 + $0x148] ss:$16 sps:$4 sm:$0xff]  }
  0x1e   : > { %s6108_s18 = scalar_lea.vmem %s7536_s0, %s5045_s14  ;;  %v5154_v44 = vld [vmem:[%s7537_s1 + $0x164] ss:$16 sps:$4 sm:$0xff]   ;;  %v5156_v45 = vld [vmem:[%s7537_s1 + $0x16c] ss:$16 sps:$4 sm:$0xff]   ;;  %v5158_v48 = vld [vmem:[%s7537_s1 + $0x160] ss:$16 sps:$4 sm:$0xff]  }
  0x1f   : > { %v369_v46 = vld [vmem:[%s6108_s18 + $0x8] sm:$0xff]  ;;  %v376_v47 = vld [vmem:[%s6108_s18 + $0x40] sm:$0xff]  ;;  %v375_v5 = vld [vmem:[%s6108_s18 + $0x38] sm:$0xff]  ;;  %s5044_s14 = smul.u32 112, %s341_s27  ;;  %s7475_s23 = scalar_lea.sflag [#allocation3], %s341_s27 }
  0x20   : > { %1600 = vmatpush1.bf16.msra.mxu0 %v5116_v18  ;;  %1772 = vmatpush1.bf16.msra.mxu1 %v5117_v19  ;;  %v5159_v49 = vld [vmem:[%s7537_s1 + $0x168] ss:$16 sps:$4 sm:$0xff]   ;;  %v383_v50 = vpack.c.bf16 %v376_v47, %v369_v46  ;;  %v5160_v51 = vld [vmem:[%s7537_s1 + $0x184] ss:$16 sps:$4 sm:$0xff]   ;;  %v5162_v52 = vld [vmem:[%s7537_s1 + $0x18c] ss:$16 sps:$4 sm:$0xff]  }
  0x21   : > { %1601 = vmatprep.subr.bf16.mxu0 %v5118_v20  ;;  %1773 = vmatprep.subr.bf16.mxu1 %v5120_v21  ;;  %v5164_v53 = vld [vmem:[%s7537_s1 + $0x180] ss:$16 sps:$4 sm:$0xff]   ;;  %v5165_v54 = vld [vmem:[%s7537_s1 + $0x188] ss:$16 sps:$4 sm:$0xff]   ;;  %v5166_v55 = vld [vmem:[%s7537_s1 + $0x1a4] ss:$16 sps:$4 sm:$0xff]  }
  0x22   : > { %1623 = vmatprep.mubr.bf16.mxu0 %v383_v50  ;;  %1795 = vmatprep.mubr.bf16.mxu1 %v383_v50  ;;  %v5168_v56 = vld [vmem:[%s7537_s1 + $0x1ac] ss:$16 sps:$4 sm:$0xff]   ;;  %v5170_v57 = vld [vmem:[%s7537_s1 + $0x1a0] ss:$16 sps:$4 sm:$0xff]   ;;  %v5171_v58 = vld [vmem:[%s7537_s1 + $0x1a8] ss:$16 sps:$4 sm:$0xff]  }
  0x23   : > { %v5172_v59 = vld [vmem:[%s7537_s1 + $0x1c4] ss:$16 sps:$4 sm:$0xff]   ;;  %v5174_v60 = vld [vmem:[%s7537_s1 + $0x1cc] ss:$16 sps:$4 sm:$0xff]   ;;  %v5176_v61 = vld [vmem:[%s7537_s1 + $0x1c0] ss:$16 sps:$4 sm:$0xff]  }
  0x24   : > { %1602 = vmatpush1.bf16.msra.mxu0 %v5122_v22  ;;  %1774 = vmatpush1.bf16.msra.mxu1 %v5123_v23  ;;  %v5177_v62 = vld [vmem:[%s7537_s1 + $0x1c8] ss:$16 sps:$4 sm:$0xff]   ;;  %v5178_v63 = vld [vmem:[%s7537_s1 + $0x1e4] ss:$16 sps:$4 sm:$0xff]   ;;  %v5180_v0 = vld [vmem:[%s7537_s1 + $0x1ec] ss:$16 sps:$4 sm:$0xff]  }
  0x25   : > { %1603 = vmatprep.subr.bf16.mxu0 %v5124_v24  ;;  %1775 = vmatprep.subr.bf16.mxu1 %v5126_v25  ;;  %v5182_v1 = vld [vmem:[%s7537_s1 + $0x1e0] ss:$16 sps:$4 sm:$0xff]   ;;  %v5183_v2 = vld [vmem:[%s7537_s1 + $0x1e8] ss:$16 sps:$4 sm:$0xff]   ;;  %v5186_v3 = vld [vmem:[%s7537_s1 + $0x204] ss:$16 sps:$4 sm:$0xff]  }
  0x26   : > { %v368_v4 = vld [vmem:[%s6108_s18] sm:$0xff]  ;;  %v5189_v6 = vld [vmem:[%s7537_s1 + $0x20c] ss:$16 sps:$4 sm:$0xff]   ;;  %v5187_v8 = vld [vmem:[%s7537_s1 + $0x208] ss:$16 sps:$4 sm:$0xff]   ;;  %s7449_s28 = scalar_lea.vmem [#allocation2], %s5044_s14 }
  0x27   : > { %v5184_v7 = vld [vmem:[%s7537_s1 + $0x200] ss:$16 sps:$4 sm:$0xff]   ;;  %v382_v9 = vpack.c.bf16 %v375_v5, %v368_v4  ;;  %v5192_v10 = vld [vmem:[%s7537_s1 + $0x224] ss:$16 sps:$4 sm:$0xff]   ;;  %v5195_v11 = vld [vmem:[%s7537_s1 + $0x22c] ss:$16 sps:$4 sm:$0xff]  }
  0x28   : > { %1604 = vmatpush1.bf16.msra.mxu0 %v5128_v26  ;;  %1776 = vmatpush1.bf16.msra.mxu1 %v5129_v27  ;;  %v5190_v12 = vld [vmem:[%s7537_s1 + $0x220] ss:$16 sps:$4 sm:$0xff]   ;;  %v5193_v13 = vld [vmem:[%s7537_s1 + $0x228] ss:$16 sps:$4 sm:$0xff]   ;;  %v5198_v14 = vld [vmem:[%s7537_s1 + $0x244] ss:$16 sps:$4 sm:$0xff]  }
  0x29   : > { %1605 = vmatprep.subr.bf16.mxu0 %v5130_v28  ;;  %1777 = vmatprep.subr.bf16.mxu1 %v5132_v29  ;;  %v5201_v15 = vld [vmem:[%s7537_s1 + $0x24c] ss:$16 sps:$4 sm:$0xff]   ;;  %v5196_v16 = vld [vmem:[%s7537_s1 + $0x240] ss:$16 sps:$4 sm:$0xff]   ;;  %v5199_v17 = vld [vmem:[%s7537_s1 + $0x248] ss:$16 sps:$4 sm:$0xff]  }
  0x2a   : > { %v5204_v18 = vld [vmem:[%s7537_s1 + $0x264] ss:$16 sps:$4 sm:$0xff]   ;;  %v5207_v19 = vld [vmem:[%s7537_s1 + $0x26c] ss:$16 sps:$4 sm:$0xff]   ;;  %v5202_v20 = vld [vmem:[%s7537_s1 + $0x260] ss:$16 sps:$4 sm:$0xff]  }
  0x2b   : > { %v5205_v21 = vld [vmem:[%s7537_s1 + $0x268] ss:$16 sps:$4 sm:$0xff]   ;;  %v5210_v22 = vld [vmem:[%s7537_s1 + $0x284] ss:$16 sps:$4 sm:$0xff]   ;;  %v5213_v23 = vld [vmem:[%s7537_s1 + $0x28c] ss:$16 sps:$4 sm:$0xff]  }
  0x2c   : > { %1606 = vmatpush1.bf16.msra.mxu0 %v5134_v30  ;;  %1778 = vmatpush1.bf16.msra.mxu1 %v5135_v31  ;;  %v5208_v24 = vld [vmem:[%s7537_s1 + $0x280] ss:$16 sps:$4 sm:$0xff]   ;;  %v5211_v25 = vld [vmem:[%s7537_s1 + $0x288] ss:$16 sps:$4 sm:$0xff]   ;;  %v5216_v26 = vld [vmem:[%s7537_s1 + $0x2a4] ss:$16 sps:$4 sm:$0xff]  }
  0x2d   : > { %1607 = vmatprep.subr.bf16.mxu0 %v5136_v32  ;;  %1779 = vmatprep.subr.bf16.mxu1 %v5138_v33  ;;  %v5219_v27 = vld [vmem:[%s7537_s1 + $0x2ac] ss:$16 sps:$4 sm:$0xff]   ;;  %v5214_v28 = vld [vmem:[%s7537_s1 + $0x2a0] ss:$16 sps:$4 sm:$0xff]   ;;  %v5217_v29 = vld [vmem:[%s7537_s1 + $0x2a8] ss:$16 sps:$4 sm:$0xff]  }
  0x2e   : > { %v5222_v30 = vld [vmem:[%s7537_s1 + $0x2c4] ss:$16 sps:$4 sm:$0xff]   ;;  %v5225_v31 = vld [vmem:[%s7537_s1 + $0x2cc] ss:$16 sps:$4 sm:$0xff]   ;;  %v5238_v47 = vld [vmem:[%s7537_s1 + $0x320] ss:$16 sps:$4 sm:$0xff]  }
  0x2f   : > { %v371_v32 = vld [vmem:[%s6108_s18 + $0x18] sm:$0xff]  ;;  %v378_v33 = vld [vmem:[%s6108_s18 + $0x50] sm:$0xff]  ;;  %s4345_s29 = ssub.s32 (%p5958_p5), 7, %s6056_s16 }
  0x30   : > { %1608 = vmatpush1.bf16.msra.mxu0 %v5140_v34  ;;  %1780 = vmatpush1.bf16.msra.mxu1 %v5141_v35  ;;  %v5220_v34 = vld [vmem:[%s7537_s1 + $0x2c0] ss:$16 sps:$4 sm:$0xff]   ;;  %v5223_v35 = vld [vmem:[%s7537_s1 + $0x2c8] ss:$16 sps:$4 sm:$0xff]   ;;  %v5243_v46 = vld [vmem:[%s7537_s1 + $0x32c] ss:$16 sps:$4 sm:$0xff]  }
  0x31   : > { %1609 = vmatprep.subr.bf16.mxu0 %v5142_v36  ;;  %1781 = vmatprep.subr.bf16.mxu1 %v5144_v37  ;;  %v385_v36 = vpack.c.bf16 %v378_v33, %v371_v32  ;;  %v5228_v37 = vld [vmem:[%s7537_s1 + $0x2e4] ss:$16 sps:$4 sm:$0xff]   ;;  %v5249_v50 = vld [vmem:[%s7537_s1 + $0x34c] ss:$16 sps:$4 sm:$0xff]   ;;  %v5271_v4 = vld [vmem:[%s7537_s1 + $0x3c8] ss:$16 sps:$4 sm:$0xff]  }
  0x32   : > { %v5276_v5 = vld [vmem:[%s7537_s1 + $0x3e4] ss:$16 sps:$4 sm:$0xff]   ;;  %v5309_v32 = vld [vmem:[%s7537_s1 + $0x48c] ss:$16 sps:$4 sm:$0xff]   ;;  %v5304_v33 = vld [vmem:[%s7537_s1 + $0x480] ss:$16 sps:$4 sm:$0xff]  }
  0x33   : > { %p4346_p11 = scmp.lt.s32.totalorder (%p5958_p5), %s4345_s29, 2 }
  0x34   : > { %1610 = vmatpush1.bf16.msra.mxu0 %v5146_v38  ;;  %1782 = vmatpush1.bf16.msra.mxu1 %v5147_v39  ;;  %v5231_v38 = vld [vmem:[%s7537_s1 + $0x2ec] ss:$16 sps:$4 sm:$0xff]   ;;  %v5226_v39 = vld [vmem:[%s7537_s1 + $0x2e0] ss:$16 sps:$4 sm:$0xff]  }
  0x35   : > { %1611 = vmatprep.subr.bf16.mxu0 %v5148_v40  ;;  %1783 = vmatprep.subr.bf16.mxu1 %v5150_v41  ;;  %v5229_v40 = vld [vmem:[%s7537_s1 + $0x2e8] ss:$16 sps:$4 sm:$0xff]   ;;  %v5234_v41 = vld [vmem:[%s7537_s1 + $0x304] ss:$16 sps:$4 sm:$0xff]  }
  0x38   : > { %1612 = vmatpush1.bf16.msra.mxu0 %v5152_v42  ;;  %1784 = vmatpush1.bf16.msra.mxu1 %v5153_v43  ;;  %v5237_v42 = vld [vmem:[%s7537_s1 + $0x30c] ss:$16 sps:$4 sm:$0xff]   ;;  %v5232_v43 = vld [vmem:[%s7537_s1 + $0x300] ss:$16 sps:$4 sm:$0xff]  }
  0x39   : > { %1613 = vmatprep.subr.bf16.mxu0 %v5154_v44  ;;  %1785 = vmatprep.subr.bf16.mxu1 %v5156_v45  ;;  %v5235_v44 = vld [vmem:[%s7537_s1 + $0x308] ss:$16 sps:$4 sm:$0xff]   ;;  %v5240_v45 = vld [vmem:[%s7537_s1 + $0x324] ss:$16 sps:$4 sm:$0xff]  }
  0x3c   : > { %1614 = vmatpush1.bf16.msra.mxu0 %v5158_v48  ;;  %1786 = vmatpush1.bf16.msra.mxu1 %v5159_v49  ;;  %v5241_v48 = vld [vmem:[%s7537_s1 + $0x328] ss:$16 sps:$4 sm:$0xff]   ;;  %v5246_v49 = vld [vmem:[%s7537_s1 + $0x344] ss:$16 sps:$4 sm:$0xff]  }
  0x3d   : > { %1615 = vmatprep.subr.bf16.mxu0 %v5160_v51  ;;  %1787 = vmatprep.subr.bf16.mxu1 %v5162_v52  ;;  %v5244_v51 = vld [vmem:[%s7537_s1 + $0x340] ss:$16 sps:$4 sm:$0xff]   ;;  %v5247_v52 = vld [vmem:[%s7537_s1 + $0x348] ss:$16 sps:$4 sm:$0xff]  }
  0x40   : > { %1616 = vmatpush1.bf16.msra.mxu0 %v5164_v53  ;;  %1788 = vmatpush1.bf16.msra.mxu1 %v5165_v54  ;;  %v5252_v53 = vld [vmem:[%s7537_s1 + $0x364] ss:$16 sps:$4 sm:$0xff]   ;;  %v5255_v54 = vld [vmem:[%s7537_s1 + $0x36c] ss:$16 sps:$4 sm:$0xff]  }
  0x41   : > { %1617 = vmatprep.subr.bf16.mxu0 %v5166_v55  ;;  %1789 = vmatprep.subr.bf16.mxu1 %v5168_v56  ;;  %v5250_v55 = vld [vmem:[%s7537_s1 + $0x360] ss:$16 sps:$4 sm:$0xff]   ;;  %v5253_v56 = vld [vmem:[%s7537_s1 + $0x368] ss:$16 sps:$4 sm:$0xff]  }
  0x44   : > { %1618 = vmatpush1.bf16.msra.mxu0 %v5170_v57  ;;  %1790 = vmatpush1.bf16.msra.mxu1 %v5171_v58  ;;  %v5258_v57 = vld [vmem:[%s7537_s1 + $0x384] ss:$16 sps:$4 sm:$0xff]   ;;  %v5261_v58 = vld [vmem:[%s7537_s1 + $0x38c] ss:$16 sps:$4 sm:$0xff]  }
  0x45   : > { %1619 = vmatprep.subr.bf16.mxu0 %v5172_v59  ;;  %1791 = vmatprep.subr.bf16.mxu1 %v5174_v60  ;;  %v5256_v59 = vld [vmem:[%s7537_s1 + $0x380] ss:$16 sps:$4 sm:$0xff]   ;;  %v5259_v60 = vld [vmem:[%s7537_s1 + $0x388] ss:$16 sps:$4 sm:$0xff]  }
  0x48   : > { %1620 = vmatpush1.bf16.msra.mxu0 %v5176_v61  ;;  %1792 = vmatpush1.bf16.msra.mxu1 %v5177_v62  ;;  %v5264_v61 = vld [vmem:[%s7537_s1 + $0x3a4] ss:$16 sps:$4 sm:$0xff]   ;;  %v5267_v62 = vld [vmem:[%s7537_s1 + $0x3ac] ss:$16 sps:$4 sm:$0xff]  }
  0x49   : > { %1621 = vmatprep.subr.bf16.mxu0 %v5178_v63  ;;  %1793 = vmatprep.subr.bf16.mxu1 %v5180_v0  ;;  %v5262_v63 = vld [vmem:[%s7537_s1 + $0x3a0] ss:$16 sps:$4 sm:$0xff]   ;;  %v5265_v0 = vld [vmem:[%s7537_s1 + $0x3a8] ss:$16 sps:$4 sm:$0xff]  }
  0x4c   : > { %1622 = vmatpush1.bf16.msra.mxu0 %v5182_v1  ;;  %1794 = vmatpush1.bf16.msra.mxu1 %v5183_v2  ;;  %v5270_v1 = vld [vmem:[%s7537_s1 + $0x3c4] ss:$16 sps:$4 sm:$0xff]   ;;  %v5273_v2 = vld [vmem:[%s7537_s1 + $0x3cc] ss:$16 sps:$4 sm:$0xff]  }
  0x4d   : > { %1634 = vmatprep.subr.bf16.mxu0 %v5186_v3  ;;  %1806 = vmatprep.subr.bf16.mxu1 %v5189_v6  ;;  %v5268_v3 = vld [vmem:[%s7537_s1 + $0x3c0] ss:$16 sps:$4 sm:$0xff]   ;;  %v5279_v6 = vld [vmem:[%s7537_s1 + $0x3ec] ss:$16 sps:$4 sm:$0xff]  }
  0x4f   : > { %1624 = vmatmul.mubr.bf16.vlgmr.msra.gmra.mrb[0].mxu0 %v382_v9  ;;  %1796 = vmatmul.mubr.bf16.vlgmr.msra.gmra.mrb[0].mxu1 %v382_v9  ;;  %v5282_v9 = vld [vmem:[%s7537_s1 + $0x404] ss:$16 sps:$4 sm:$0xff]  }
  0x50   : > { %1635 = vmatpush1.bf16.msra.mxu0 %v5184_v7  ;;  %1807 = vmatpush1.bf16.msra.mxu1 %v5187_v8  ;;  %v5274_v7 = vld [vmem:[%s7537_s1 + $0x3e0] ss:$16 sps:$4 sm:$0xff]   ;;  %v5277_v8 = vld [vmem:[%s7537_s1 + $0x3e8] ss:$16 sps:$4 sm:$0xff]  }
  0x51   : > { %1636 = vmatprep.subr.bf16.mxu0 %v5192_v10  ;;  %1808 = vmatprep.subr.bf16.mxu1 %v5195_v11  ;;  %v370_v10 = vld [vmem:[%s6108_s18 + $0x10] sm:$0xff]  ;;  %v377_v11 = vld [vmem:[%s6108_s18 + $0x48] sm:$0xff] }
  0x52   : > { %1666 = vmatprep.mubr.bf16.mxu0 %v385_v36  ;;  %1838 = vmatprep.mubr.bf16.mxu1 %v385_v36  ;;  %v5315_v36 = vld [vmem:[%s7537_s1 + $0x4ac] ss:$16 sps:$4 sm:$0xff]  }
  0x54   : > { %1637 = vmatpush1.bf16.msra.mxu0 %v5190_v12  ;;  %1809 = vmatpush1.bf16.msra.mxu1 %v5193_v13  ;;  %v5285_v12 = vld [vmem:[%s7537_s1 + $0x40c] ss:$16 sps:$4 sm:$0xff]   ;;  %v5280_v13 = vld [vmem:[%s7537_s1 + $0x400] ss:$16 sps:$4 sm:$0xff]  }
  0x55   : > { %1638 = vmatprep.subr.bf16.mxu0 %v5198_v14  ;;  %1810 = vmatprep.subr.bf16.mxu1 %v5201_v15  ;;  %v5283_v14 = vld [vmem:[%s7537_s1 + $0x408] ss:$16 sps:$4 sm:$0xff]   ;;  %v384_v15 = vpack.c.bf16 %v377_v11, %v370_v10  ;;  %v5372_v11 = vld [vmem:[%s7537_s1 + $0x5e4] ss:$16 sps:$4 sm:$0xff]  }
  0x56   : > { %v5367_v10 = vld [vmem:[%s7537_s1 + $0x5c8] ss:$16 sps:$4 sm:$0xff]  }
  0x58   : > { %1639 = vmatpush1.bf16.msra.mxu0 %v5196_v16  ;;  %1811 = vmatpush1.bf16.msra.mxu1 %v5199_v17  ;;  %v5288_v16 = vld [vmem:[%s7537_s1 + $0x424] ss:$16 sps:$4 sm:$0xff]   ;;  %v5291_v17 = vld [vmem:[%s7537_s1 + $0x42c] ss:$16 sps:$4 sm:$0xff]  }
  0x59   : > { %1640 = vmatprep.subr.bf16.mxu0 %v5204_v18  ;;  %1812 = vmatprep.subr.bf16.mxu1 %v5207_v19  ;;  %v373_v18 = vld [vmem:[%s6108_s18 + $0x28] sm:$0xff]  ;;  %v5286_v19 = vld [vmem:[%s7537_s1 + $0x420] ss:$16 sps:$4 sm:$0xff]  }
  0x5c   : > { %1641 = vmatpush1.bf16.msra.mxu0 %v5202_v20  ;;  %1813 = vmatpush1.bf16.msra.mxu1 %v5205_v21  ;;  %v5289_v20 = vld [vmem:[%s7537_s1 + $0x428] ss:$16 sps:$4 sm:$0xff]   ;;  %v380_v21 = vld [vmem:[%s6108_s18 + $0x60] sm:$0xff] }
  0x5d   : > { %1642 = vmatprep.subr.bf16.mxu0 %v5210_v22  ;;  %1814 = vmatprep.subr.bf16.mxu1 %v5213_v23  ;;  %v5294_v22 = vld [vmem:[%s7537_s1 + $0x444] ss:$16 sps:$4 sm:$0xff]   ;;  %v387_v23 = vpack.c.bf16 %v380_v21, %v373_v18  ;;  %v5381_v18 = vld [vmem:[%s7537_s1 + $0x60c] ss:$16 sps:$4 sm:$0xff]  }
  0x60   : > { %1643 = vmatpush1.bf16.msra.mxu0 %v5208_v24  ;;  %1815 = vmatpush1.bf16.msra.mxu1 %v5211_v25  ;;  %v5297_v24 = vld [vmem:[%s7537_s1 + $0x44c] ss:$16 sps:$4 sm:$0xff]   ;;  %v5292_v25 = vld [vmem:[%s7537_s1 + $0x440] ss:$16 sps:$4 sm:$0xff]  }
  0x61   : > { %1644 = vmatprep.subr.bf16.mxu0 %v5216_v26  ;;  %1816 = vmatprep.subr.bf16.mxu1 %v5219_v27  ;;  %v5295_v26 = vld [vmem:[%s7537_s1 + $0x448] ss:$16 sps:$4 sm:$0xff]   ;;  %v5300_v27 = vld [vmem:[%s7537_s1 + $0x464] ss:$16 sps:$4 sm:$0xff]  }
  0x64   : > { %1645 = vmatpush1.bf16.msra.mxu0 %v5214_v28  ;;  %1817 = vmatpush1.bf16.msra.mxu1 %v5217_v29  ;;  %v5303_v28 = vld [vmem:[%s7537_s1 + $0x46c] ss:$16 sps:$4 sm:$0xff]   ;;  %v5298_v29 = vld [vmem:[%s7537_s1 + $0x460] ss:$16 sps:$4 sm:$0xff]  }
  0x65   : > { %1646 = vmatprep.subr.bf16.mxu0 %v5222_v30  ;;  %1818 = vmatprep.subr.bf16.mxu1 %v5225_v31  ;;  %v5301_v30 = vld [vmem:[%s7537_s1 + $0x468] ss:$16 sps:$4 sm:$0xff]   ;;  %v5306_v31 = vld [vmem:[%s7537_s1 + $0x484] ss:$16 sps:$4 sm:$0xff]  }
  0x68   : > { %1647 = vmatpush1.bf16.msra.mxu0 %v5220_v34  ;;  %1819 = vmatpush1.bf16.msra.mxu1 %v5223_v35  ;;  %v5307_v34 = vld [vmem:[%s7537_s1 + $0x488] ss:$16 sps:$4 sm:$0xff]   ;;  %v5312_v35 = vld [vmem:[%s7537_s1 + $0x4a4] ss:$16 sps:$4 sm:$0xff]  }
  0x69   : > { %1648 = vmatprep.subr.bf16.mxu0 %v5228_v37  ;;  %1820 = vmatprep.subr.bf16.mxu1 %v5231_v38  ;;  %v5310_v37 = vld [vmem:[%s7537_s1 + $0x4a0] ss:$16 sps:$4 sm:$0xff]   ;;  %v5313_v38 = vld [vmem:[%s7537_s1 + $0x4a8] ss:$16 sps:$4 sm:$0xff]  }
  0x6c   : > { %1649 = vmatpush1.bf16.msra.mxu0 %v5226_v39  ;;  %1821 = vmatpush1.bf16.msra.mxu1 %v5229_v40  ;;  %v5318_v39 = vld [vmem:[%s7537_s1 + $0x4c4] ss:$16 sps:$4 sm:$0xff]   ;;  %v5321_v40 = vld [vmem:[%s7537_s1 + $0x4cc] ss:$16 sps:$4 sm:$0xff]  }
  0x6d   : > { %1650 = vmatprep.subr.bf16.mxu0 %v5234_v41  ;;  %1822 = vmatprep.subr.bf16.mxu1 %v5237_v42  ;;  %v5316_v41 = vld [vmem:[%s7537_s1 + $0x4c0] ss:$16 sps:$4 sm:$0xff]   ;;  %v5319_v42 = vld [vmem:[%s7537_s1 + $0x4c8] ss:$16 sps:$4 sm:$0xff]  }
  0x70   : > { %1651 = vmatpush1.bf16.msra.mxu0 %v5232_v43  ;;  %1823 = vmatpush1.bf16.msra.mxu1 %v5235_v44  ;;  %v5324_v43 = vld [vmem:[%s7537_s1 + $0x4e4] ss:$16 sps:$4 sm:$0xff]   ;;  %v5327_v44 = vld [vmem:[%s7537_s1 + $0x4ec] ss:$16 sps:$4 sm:$0xff]  }
  0x71   : > { %1652 = vmatprep.subr.bf16.mxu0 %v5240_v45  ;;  %1824 = vmatprep.subr.bf16.mxu1 %v5243_v46  ;;  %v5322_v45 = vld [vmem:[%s7537_s1 + $0x4e0] ss:$16 sps:$4 sm:$0xff]   ;;  %v5325_v46 = vld [vmem:[%s7537_s1 + $0x4e8] ss:$16 sps:$4 sm:$0xff]  }
  0x74   : > { %1653 = vmatpush1.bf16.msra.mxu0 %v5238_v47  ;;  %1825 = vmatpush1.bf16.msra.mxu1 %v5241_v48  ;;  %v5330_v47 = vld [vmem:[%s7537_s1 + $0x504] ss:$16 sps:$4 sm:$0xff]   ;;  %v5333_v48 = vld [vmem:[%s7537_s1 + $0x50c] ss:$16 sps:$4 sm:$0xff]  }
  0x75   : > { %1654 = vmatprep.subr.bf16.mxu0 %v5246_v49  ;;  %1826 = vmatprep.subr.bf16.mxu1 %v5249_v50  ;;  %v5328_v49 = vld [vmem:[%s7537_s1 + $0x500] ss:$16 sps:$4 sm:$0xff]   ;;  %v5331_v50 = vld [vmem:[%s7537_s1 + $0x508] ss:$16 sps:$4 sm:$0xff]  }
  0x78   : > { %1655 = vmatpush1.bf16.msra.mxu0 %v5244_v51  ;;  %1827 = vmatpush1.bf16.msra.mxu1 %v5247_v52  ;;  %v5336_v51 = vld [vmem:[%s7537_s1 + $0x524] ss:$16 sps:$4 sm:$0xff]   ;;  %v5339_v52 = vld [vmem:[%s7537_s1 + $0x52c] ss:$16 sps:$4 sm:$0xff]  }
  0x79   : > { %1656 = vmatprep.subr.bf16.mxu0 %v5252_v53  ;;  %1828 = vmatprep.subr.bf16.mxu1 %v5255_v54  ;;  %v5334_v53 = vld [vmem:[%s7537_s1 + $0x520] ss:$16 sps:$4 sm:$0xff]   ;;  %v5337_v54 = vld [vmem:[%s7537_s1 + $0x528] ss:$16 sps:$4 sm:$0xff]  }
  0x7c   : > { %1657 = vmatpush1.bf16.msra.mxu0 %v5250_v55  ;;  %1829 = vmatpush1.bf16.msra.mxu1 %v5253_v56  ;;  %v5342_v55 = vld [vmem:[%s7537_s1 + $0x544] ss:$16 sps:$4 sm:$0xff]   ;;  %v5345_v56 = vld [vmem:[%s7537_s1 + $0x54c] ss:$16 sps:$4 sm:$0xff]  }
  0x7d   : > { %1658 = vmatprep.subr.bf16.mxu0 %v5258_v57  ;;  %1830 = vmatprep.subr.bf16.mxu1 %v5261_v58  ;;  %v5340_v57 = vld [vmem:[%s7537_s1 + $0x540] ss:$16 sps:$4 sm:$0xff]   ;;  %v5343_v58 = vld [vmem:[%s7537_s1 + $0x548] ss:$16 sps:$4 sm:$0xff]  }
  0x80   : > { %1659 = vmatpush1.bf16.msra.mxu0 %v5256_v59  ;;  %1831 = vmatpush1.bf16.msra.mxu1 %v5259_v60  ;;  %v5348_v59 = vld [vmem:[%s7537_s1 + $0x564] ss:$16 sps:$4 sm:$0xff]   ;;  %v5351_v60 = vld [vmem:[%s7537_s1 + $0x56c] ss:$16 sps:$4 sm:$0xff]  }
  0x81   : > { %1660 = vmatprep.subr.bf16.mxu0 %v5264_v61  ;;  %1832 = vmatprep.subr.bf16.mxu1 %v5267_v62  ;;  %v5346_v61 = vld [vmem:[%s7537_s1 + $0x560] ss:$16 sps:$4 sm:$0xff]   ;;  %v5349_v62 = vld [vmem:[%s7537_s1 + $0x568] ss:$16 sps:$4 sm:$0xff]  }
  0x84   : > { %1661 = vmatpush1.bf16.msra.mxu0 %v5262_v63  ;;  %1833 = vmatpush1.bf16.msra.mxu1 %v5265_v0  ;;  %v5354_v63 = vld [vmem:[%s7537_s1 + $0x584] ss:$16 sps:$4 sm:$0xff]   ;;  %v5357_v0 = vld [vmem:[%s7537_s1 + $0x58c] ss:$16 sps:$4 sm:$0xff]  }
  0x85   : > { %1662 = vmatprep.subr.bf16.mxu0 %v5270_v1  ;;  %1834 = vmatprep.subr.bf16.mxu1 %v5273_v2  ;;  %v5352_v1 = vld [vmem:[%s7537_s1 + $0x580] ss:$16 sps:$4 sm:$0xff]   ;;  %v5355_v2 = vld [vmem:[%s7537_s1 + $0x588] ss:$16 sps:$4 sm:$0xff]  }
  0x88   : > { %1663 = vmatpush1.bf16.msra.mxu0 %v5268_v3  ;;  %1835 = vmatpush1.bf16.msra.mxu1 %v5271_v4  ;;  %v5360_v3 = vld [vmem:[%s7537_s1 + $0x5a4] ss:$16 sps:$4 sm:$0xff]   ;;  %v5363_v4 = vld [vmem:[%s7537_s1 + $0x5ac] ss:$16 sps:$4 sm:$0xff]  }
  0x89   : > { %1664 = vmatprep.subr.bf16.mxu0 %v5276_v5  ;;  %1836 = vmatprep.subr.bf16.mxu1 %v5279_v6  ;;  %v5358_v5 = vld [vmem:[%s7537_s1 + $0x5a0] ss:$16 sps:$4 sm:$0xff]   ;;  %v5361_v6 = vld [vmem:[%s7537_s1 + $0x5a8] ss:$16 sps:$4 sm:$0xff]  }
  0x8c   : > { %1665 = vmatpush1.bf16.msra.mxu0 %v5274_v7  ;;  %1837 = vmatpush1.bf16.msra.mxu1 %v5277_v8  ;;  %v5366_v7 = vld [vmem:[%s7537_s1 + $0x5c4] ss:$16 sps:$4 sm:$0xff]   ;;  %v5369_v8 = vld [vmem:[%s7537_s1 + $0x5cc] ss:$16 sps:$4 sm:$0xff]  }
  0x8d   : > { %1677 = vmatprep.subr.bf16.mxu0 %v5282_v9  ;;  %1849 = vmatprep.subr.bf16.mxu1 %v5285_v12  ;;  %v5364_v9 = vld [vmem:[%s7537_s1 + $0x5c0] ss:$16 sps:$4 sm:$0xff]   ;;  %v5375_v12 = vld [vmem:[%s7537_s1 + $0x5ec] ss:$16 sps:$4 sm:$0xff]  }
  0x8f   : > { %1667 = vmatmul.mubr.bf16.vlgmr.msra.gmra.mrb[0].mxu0 %v384_v15  ;;  %1839 = vmatmul.mubr.bf16.vlgmr.msra.gmra.mrb[0].mxu1 %v384_v15  ;;  %v372_v15 = vld [vmem:[%s6108_s18 + $0x20] sm:$0xff] }
  0x90   : > { %1678 = vmatpush1.bf16.msra.mxu0 %v5280_v13  ;;  %1850 = vmatpush1.bf16.msra.mxu1 %v5283_v14  ;;  %v5370_v13 = vld [vmem:[%s7537_s1 + $0x5e0] ss:$16 sps:$4 sm:$0xff]   ;;  %v5373_v14 = vld [vmem:[%s7537_s1 + $0x5e8] ss:$16 sps:$4 sm:$0xff]  }
  0x91   : > { %1679 = vmatprep.subr.bf16.mxu0 %v5288_v16  ;;  %1851 = vmatprep.subr.bf16.mxu1 %v5291_v17  ;;  %v379_v16 = vld [vmem:[%s6108_s18 + $0x58] sm:$0xff]  ;;  %v5378_v17 = vld [vmem:[%s7537_s1 + $0x604] ss:$16 sps:$4 sm:$0xff]  }
  0x92   : > { %1709 = vmatprep.mubr.bf16.mxu0 %v387_v23  ;;  %1881 = vmatprep.mubr.bf16.mxu1 %v387_v23  ;;  %v386_v21 = vpack.c.bf16 %v379_v16, %v372_v15  ;;  %v5866_v23 = vmov 0  }
  0x94   : > { %1680 = vmatpush1.bf16.msra.mxu0 %v5286_v19  ;;  %1852 = vmatpush1.bf16.msra.mxu1 %v5289_v20  ;;  %v5376_v19 = vld [vmem:[%s7537_s1 + $0x600] ss:$16 sps:$4 sm:$0xff]   ;;  %v5379_v20 = vld [vmem:[%s7537_s1 + $0x608] ss:$16 sps:$4 sm:$0xff]  }
  0x95   : > { %1681 = vmatprep.subr.bf16.mxu0 %v5294_v22  ;;  %1853 = vmatprep.subr.bf16.mxu1 %v5297_v24  ;;  %v5382_v22 = vld [vmem:[%s7539_s3 + $0x40] sm:$0xff]   ;;  %v374_v24 = vld [vmem:[%s6108_s18 + $0x30] sm:$0xff] }
  0x98   : > { %1682 = vmatpush1.bf16.msra.mxu0 %v5292_v25  ;;  %1854 = vmatpush1.bf16.msra.mxu1 %v5295_v26  ;;  %v381_v25 = vld [vmem:[%s6108_s18 + $0x68] sm:$0xff]  ;;  %v5383_v26 = vld [vmem:[%s7539_s3] sm:$0xff]  }
  0x99   : > { %1683 = vmatprep.subr.bf16.mxu0 %v5300_v27  ;;  %1855 = vmatprep.subr.bf16.mxu1 %v5303_v28  ;;  %v388_v27 = vpack.c.bf16 %v381_v25, %v374_v24  ;;  %v5384_v28 = vld [vmem:[%s7539_s3 + $0x48] sm:$0xff]   ;;  %v5404_v24 = vld [vmem:[%s7539_s3 + $0xd8] sm:$0xff]  }
  0x9a   : > { %v5405_v25 = vld [vmem:[%s7539_s3 + $0x98] sm:$0xff]  }
  0x9c   : > { %1684 = vmatpush1.bf16.msra.mxu0 %v5298_v29  ;;  %1856 = vmatpush1.bf16.msra.mxu1 %v5301_v30  ;;  %v5385_v29 = vld [vmem:[%s7539_s3 + $0x8] sm:$0xff]   ;;  %v5386_v30 = vld [vmem:[%s7539_s3 + $0x50] sm:$0xff]  }
  0x9d   : > { %1685 = vmatprep.subr.bf16.mxu0 %v5306_v31  ;;  %1857 = vmatprep.subr.bf16.mxu1 %v5309_v32  ;;  %v5387_v31 = vld [vmem:[%s7539_s3 + $0x10] sm:$0xff]   ;;  %v5388_v32 = vld [vmem:[%s7539_s3 + $0x58] sm:$0xff]  }
  0xa0   : > { %1686 = vmatpush1.bf16.msra.mxu0 %v5304_v33  ;;  %1858 = vmatpush1.bf16.msra.mxu1 %v5307_v34  ;;  %v5389_v33 = vld [vmem:[%s7539_s3 + $0x18] sm:$0xff]   ;;  %v5390_v34 = vld [vmem:[%s7539_s3 + $0x60] sm:$0xff]  }
  0xa1   : > { %1687 = vmatprep.subr.bf16.mxu0 %v5312_v35  ;;  %1859 = vmatprep.subr.bf16.mxu1 %v5315_v36  ;;  %v5391_v35 = vld [vmem:[%s7539_s3 + $0x20] sm:$0xff]   ;;  %v5392_v36 = vld [vmem:[%s7539_s3 + $0x68] sm:$0xff]  }
  0xa4   : > { %1688 = vmatpush1.bf16.msra.mxu0 %v5310_v37  ;;  %1860 = vmatpush1.bf16.msra.mxu1 %v5313_v38  ;;  %v5393_v37 = vld [vmem:[%s7539_s3 + $0x28] sm:$0xff]   ;;  %v5394_v38 = vld [vmem:[%s7539_s3 + $0x70] sm:$0xff]  }
  0xa5   : > { %1689 = vmatprep.subr.bf16.mxu0 %v5318_v39  ;;  %1861 = vmatprep.subr.bf16.mxu1 %v5321_v40  ;;  %v5395_v39 = vld [vmem:[%s7539_s3 + $0x30] sm:$0xff]   ;;  %v5396_v40 = vld [vmem:[%s7539_s3 + $0x78] sm:$0xff]  }
  0xa8   : > { %1690 = vmatpush1.bf16.msra.mxu0 %v5316_v41  ;;  %1862 = vmatpush1.bf16.msra.mxu1 %v5319_v42  ;;  %v5397_v41 = vld [vmem:[%s7539_s3 + $0x38] sm:$0xff]   ;;  %v5398_v42 = vld [vmem:[%s7539_s3 + $0xc0] sm:$0xff]  }
  0xa9   : > { %1691 = vmatprep.subr.bf16.mxu0 %v5324_v43  ;;  %1863 = vmatprep.subr.bf16.mxu1 %v5327_v44  ;;  %v587_v43 = vlaneseq }
  0xab   : > { %v6636_v44 = vshrl.u32 %v587_v43, 7 }
  0xac   : > { %1692 = vmatpush1.bf16.msra.mxu0 %v5322_v45  ;;  %1864 = vmatpush1.bf16.msra.mxu1 %v5325_v46 }
  0xad   : > { %1693 = vmatprep.subr.bf16.mxu0 %v5330_v47  ;;  %1865 = vmatprep.subr.bf16.mxu1 %v5333_v48  ;;  %v6639_v45 = vsub.s32 0, %v6636_v44  ;;  %v6642_v46 = vsub.s32 2, %v6636_v44  ;;  %v585_v47 = vld [vmem:[%s7538_s2] sm:$0xf]  ;;  %v6648_v48 = vsub.s32 1, %v6636_v44 }
  0xb0   : > { %1694 = vmatpush1.bf16.msra.mxu0 %v5328_v49  ;;  %1866 = vmatpush1.bf16.msra.mxu1 %v5331_v50  ;;  %v6651_v49 = vsub.s32 3, %v6636_v44  ;;  %v590_v50 = vrot.slane %v585_v47, %v6639_v45 }
  0xb1   : > { %1695 = vmatprep.subr.bf16.mxu0 %v5336_v51  ;;  %1867 = vmatprep.subr.bf16.mxu1 %v5339_v52  ;;  %v598_v51 = vrot.slane %v585_v47, %v6642_v46  ;;  %v594_v52 = vrot.slane %v585_v47, %v6648_v48 }
  0xb4   : > { %1696 = vmatpush1.bf16.msra.mxu0 %v5334_v53  ;;  %1868 = vmatpush1.bf16.msra.mxu1 %v5337_v54  ;;  %v602_v53 = vrot.slane %v585_v47, %v6651_v49 }
  0xb5   : > { %1697 = vmatprep.subr.bf16.mxu0 %v5342_v55  ;;  %1869 = vmatprep.subr.bf16.mxu1 %v5345_v56 }
  0xb8   : > { %1698 = vmatpush1.bf16.msra.mxu0 %v5340_v57  ;;  %1870 = vmatpush1.bf16.msra.mxu1 %v5343_v58 }
  0xb9   : > { %1699 = vmatprep.subr.bf16.mxu0 %v5348_v59  ;;  %1871 = vmatprep.subr.bf16.mxu1 %v5351_v60 }
  0xbc   : > { %1700 = vmatpush1.bf16.msra.mxu0 %v5346_v61  ;;  %1872 = vmatpush1.bf16.msra.mxu1 %v5349_v62 }
  0xbd   : > { %1701 = vmatprep.subr.bf16.mxu0 %v5354_v63  ;;  %1873 = vmatprep.subr.bf16.mxu1 %v5357_v0 }
  0xc0   : > { %1702 = vmatpush1.bf16.msra.mxu0 %v5352_v1  ;;  %1874 = vmatpush1.bf16.msra.mxu1 %v5355_v2 }
  0xc1   : > { %1703 = vmatprep.subr.bf16.mxu0 %v5360_v3  ;;  %1875 = vmatprep.subr.bf16.mxu1 %v5363_v4 }
  0xc4   : > { %1704 = vmatpush1.bf16.msra.mxu0 %v5358_v5  ;;  %1876 = vmatpush1.bf16.msra.mxu1 %v5361_v6 }
  0xc5   : > { %1705 = vmatprep.subr.bf16.mxu0 %v5366_v7  ;;  %1877 = vmatprep.subr.bf16.mxu1 %v5369_v8 }
  0xc8   : > { %1706 = vmatpush1.bf16.msra.mxu0 %v5364_v9  ;;  %1878 = vmatpush1.bf16.msra.mxu1 %v5367_v10 }
  0xc9   : > { %1707 = vmatprep.subr.bf16.mxu0 %v5372_v11  ;;  %1879 = vmatprep.subr.bf16.mxu1 %v5375_v12 }
  0xcc   : > { %1708 = vmatpush1.bf16.msra.mxu0 %v5370_v13  ;;  %1880 = vmatpush1.bf16.msra.mxu1 %v5373_v14 }
  0xcd   : > { %1720 = vmatprep.subr.bf16.mxu0 %v5378_v17  ;;  %1892 = vmatprep.subr.bf16.mxu1 %v5381_v18  ;;  %v5399_v18 = vld [vmem:[%s7539_s3 + $0x80] sm:$0xff]  }
  0xcf   : > { %1710 = vmatmul.mubr.bf16.vlgmr.msra.gmra.mrb[0].mxu0 %v386_v21  ;;  %1882 = vmatmul.mubr.bf16.vlgmr.msra.gmra.mrb[0].mxu1 %v386_v21  ;;  %v5402_v21 = vld [vmem:[%s7539_s3 + $0xd0] sm:$0xff]  }
  0xd0   : > { %1721 = vmatpush1.bf16.msra.mxu0 %v5376_v19  ;;  %1893 = vmatpush1.bf16.msra.mxu1 %v5379_v20  ;;  %v5400_v19 = vld [vmem:[%s7539_s3 + $0xc8] sm:$0xff]  }
  0xd1   : > { %1752 = vmatprep.mubr.bf16.mxu0 %v5866_v23  ;;  %1924 = vmatprep.mubr.bf16.mxu1 %v5866_v23  ;;  %v5401_v20 = vld [vmem:[%s7539_s3 + $0x88] sm:$0xff]  }
  0xd2   : > { %4900 = vmatprep.subr.bf16.mxu1 %v5382_v22  ;;  %v5403_v22 = vld [vmem:[%s7539_s3 + $0x90] sm:$0xff]  }
  0xdb   : > { %4622 = vmatmul.mubr.msk.bf16.vlgmr.msra.gmra.mrb[0].mxu0 %vm1587_vm0, %v388_v27  ;;  %4623 = vmatmul.mubr.msk.bf16.vlgmr.msra.gmra.mrb[0].mxu1 %vm1587_vm0, %v388_v27  ;;  %v5407_v27 = vld [vmem:[%s7539_s3 + $0xa0] sm:$0xff]  }
  0xdc   : > { %4901 = vmatpush3.bf16.msra.mxu1 %v5383_v26  ;;  %2401 = vmatprep.mubr.bf16.mxu0 %v5866_v23  ;;  %v5406_v26 = vld [vmem:[%s7539_s3 + $0xe0] sm:$0xff]  }
  0xdd   : > { %4902 = vmatprep.subr.bf16.mxu1 %v5384_v28  ;;  %v5408_v28 = vld [vmem:[%s7539_s3 + $0xe8] sm:$0xff]  }
  0xe0   : > { %4903 = vmatpush3.bf16.msra.mxu1 %v5385_v29  ;;  %v5409_v29 = vld [vmem:[%s7539_s3 + $0xa8] sm:$0xff]  }
  0xe1   : > { %4904 = vmatprep.subr.bf16.mxu1 %v5386_v30  ;;  %v5410_v30 = vld [vmem:[%s7539_s3 + $0xf0] sm:$0xff]  }
  0xe4   : > { %4905 = vmatpush3.bf16.msra.mxu1 %v5387_v31  ;;  %v5411_v31 = vld [vmem:[%s7539_s3 + $0xb0] sm:$0xff]  }
  0xe5   : > { %4906 = vmatprep.subr.bf16.mxu1 %v5388_v32  ;;  %v5412_v32 = vld [vmem:[%s7539_s3 + $0xf8] sm:$0xff]  }
  0xe8   : > { %4907 = vmatpush3.bf16.msra.mxu1 %v5389_v33  ;;  %v5413_v33 = vld [vmem:[%s7539_s3 + $0xb8] sm:$0xff]  }
  0xe9   : > { %4908 = vmatprep.subr.bf16.mxu1 %v5390_v34  ;;  %v5416_v34 = vld [vmem:[%s7541_s5 + $0x4] ss:$16 sps:$4 sm:$0xff]  }
  0xea   : > { %2369 = vmatprep.subr.bf16.mxu0 %v5416_v34  ;;  %v5471_v34 = vld [vmem:[%s7543_s7 + $0x190] ss:$28 sps:$4 sm:$0xff]  }
  0xec   : > { %4909 = vmatpush3.bf16.msra.mxu1 %v5391_v35  ;;  %v5419_v35 = vld [vmem:[%s7541_s5 + $0xc] ss:$16 sps:$4 sm:$0xff]  }
  0xed   : > { %4910 = vmatprep.subr.bf16.mxu1 %v5392_v36  ;;  %v5414_v36 = vld [vmem:[%s7541_s5] ss:$16 sps:$4 sm:$0xff]  }
  0xee   : > { %2370 = vmatpush1.bf16.msra.mxu0 %v5414_v36  ;;  %v5479_v36 = vld [vmem:[%s7543_s7 + $0x1cc] ss:$28 sps:$4 sm:$0xff]  }
  0xf0   : > { %4911 = vmatpush3.bf16.msra.mxu1 %v5393_v37  ;;  %v5417_v37 = vld [vmem:[%s7541_s5 + $0x8] ss:$16 sps:$4 sm:$0xff]  }
  0xf1   : > { %4912 = vmatprep.subr.bf16.mxu1 %v5394_v38  ;;  %v5425_v38 = vld [vmem:[%s7541_s5 + $0x2c] ss:$16 sps:$4 sm:$0xff]  }
  0xf4   : > { %4913 = vmatpush3.bf16.msra.mxu1 %v5395_v39  ;;  %v5420_v39 = vld [vmem:[%s7541_s5 + $0x20] ss:$16 sps:$4 sm:$0xff]  }
  0xf5   : > { %4914 = vmatprep.subr.bf16.mxu1 %v5396_v40  ;;  %v5423_v40 = vld [vmem:[%s7541_s5 + $0x28] ss:$16 sps:$4 sm:$0xff]  }
  0xf8   : > { %4915 = vmatpush3.bf16.msra.mxu1 %v5397_v41  ;;  %v5428_v41 = vld [vmem:[%s7543_s7 + $0x4] ss:$28 sps:$4 sm:$0xff]  }
  0xf9   : > { %4922 = vmatprep.subr.bf16.mxu1 %v5398_v42  ;;  %v5431_v42 = vld [vmem:[%s7543_s7 + $0xc] ss:$28 sps:$4 sm:$0xff]  }
 0x1ae   : > { %v1754_v54 = vpop.f32.mrb[0].mxu0  ;;  %v1926_v55 = vpop.f32.mrb[0].mxu1 }
 0x1af   : > { %v4988_v56 = vadd.f32 %v1754_v54, %v590_v50  ;;  %v4992_v57 = vadd.f32 %v1926_v55, %v598_v51  ;;  %v1756_v58 = vpop.f32.mrb[1].mxu0  ;;  %v1928_v59 = vpop.f32.mrb[1].mxu1  ;;  %v4624_v54 = vld [vmem:[%s7540_s4] ss:$0 sm:$0xff] }
 0x1b0   : > { %v4989_v60 = vadd.f32 %v1756_v58, %v594_v52  ;;  %v4993_v61 = vadd.f32 %v1928_v59, %v602_v53  ;;  %v1758_v62 = vpop.f32.mrb[2].mxu0  ;;  %v1930_v63 = vpop.f32.mrb[2].mxu1 }
 0x1b1   : > { %v4990_v0 = vadd.f32 %v1758_v62, %v590_v50  ;;  %v4994_v1 = vadd.f32 %v1930_v63, %v598_v51  ;;  %v1760_v2 = vpop.f32.mrb[3].mxu0  ;;  %v1932_v3 = vpop.f32.mrb[3].mxu1  ;;  %v1935_v6 = vmax.f32 %v4988_v56, 0.0  ;;  %v1937_v7 = vmax.f32 %v4992_v57, 0.0 }
 0x1b2   : > { %v4991_v4 = vadd.f32 %v1760_v2, %v594_v52  ;;  %v4995_v5 = vadd.f32 %v1932_v3, %v602_v53  ;;  %v1936_v10 = vmax.f32 %v4989_v60, 0.0  ;;  %v1938_v11 = vmax.f32 %v4993_v61, 0.0  ;;  %v5426_v3 = vld [vmem:[%s7543_s7] ss:$28 sps:$4 sm:$0xff]  }
 0x1b3   : > { %v1939_v8 = vmax.f32 %v4990_v0, 0.0  ;;  %v1941_v9 = vmax.f32 %v4994_v1, 0.0 }
 0x1b4   : > { %v1940_v12 = vmax.f32 %v4991_v4, 0.0  ;;  %v1942_v13 = vmax.f32 %v4995_v5, 0.0  ;;  %v5429_v4 = vld [vmem:[%s7543_s7 + $0x8] ss:$28 sps:$4 sm:$0xff]  }
 0x1b5   : > { %v1943_v14 = vpack.c.bf16 %v1939_v8, %v1935_v6  ;;  %v1945_v15 = vpack.c.bf16 %v1941_v9, %v1937_v7  ;;  %v5434_v6 = vld [vmem:[%s7543_s7 + $0x3c] ss:$28 sps:$4 sm:$0xff]   ;;  %v5437_v7 = vld [vmem:[%s7543_s7 + $0x44] ss:$28 sps:$4 sm:$0xff]  }
 0x1b6   : > { %v1944_v16 = vpack.c.bf16 %v1940_v12, %v1936_v10  ;;  %v1946_v17 = vpack.c.bf16 %v1942_v13, %v1938_v11  ;;  %v5432_v8 = vld [vmem:[%s7543_s7 + $0x38] ss:$28 sps:$4 sm:$0xff]   ;;  %v5435_v9 = vld [vmem:[%s7543_s7 + $0x40] ss:$28 sps:$4 sm:$0xff]   ;;  %v5438_v12 = vld [vmem:[%s7543_s7 + $0x70] ss:$28 sps:$4 sm:$0xff]  }
 0x1b7   : > { %v5440_v10 = vld [vmem:[%s7543_s7 + $0x74] ss:$28 sps:$4 sm:$0xff]   ;;  %v5443_v11 = vld [vmem:[%s7543_s7 + $0x7c] ss:$28 sps:$4 sm:$0xff]  }
 0x1b8   : > { %2242 = vmatprep.mubr.bf16.mxu1 %v1944_v16  ;;  %v5441_v13 = vld [vmem:[%s7543_s7 + $0x78] ss:$28 sps:$4 sm:$0xff]   ;;  %v5444_v16 = vld [vmem:[%s7543_s7 + $0xa8] ss:$28 sps:$4 sm:$0xff]  }
 0x1b9   : > { %2243 = vmatmul.mubr.bf16.vlgmr.msra.gmra.mrb[4].mxu1 %v1943_v14  ;;  %v5446_v14 = vld [vmem:[%s7543_s7 + $0xac] ss:$28 sps:$4 sm:$0xff]  }
 0x1ba   : > { %4923 = vmatpush3.bf16.msra.mxu1 %v5399_v18  ;;  %2283 = vmatprep.mubr.bf16.mxu1 %v1946_v17  ;;  %v5447_v17 = vld [vmem:[%s7543_s7 + $0xb0] ss:$28 sps:$4 sm:$0xff]   ;;  %v5452_v18 = vld [vmem:[%s7543_s7 + $0xe4] ss:$28 sps:$4 sm:$0xff]  }
 0x1bb   : > { %4924 = vmatprep.subr.bf16.mxu1 %v5400_v19  ;;  %v5455_v19 = vld [vmem:[%s7543_s7 + $0xec] ss:$28 sps:$4 sm:$0xff]  }
 0x1be   : > { %4925 = vmatpush3.bf16.msra.mxu1 %v5401_v20  ;;  %v5450_v20 = vld [vmem:[%s7543_s7 + $0xe0] ss:$28 sps:$4 sm:$0xff]  }
 0x1bf   : > { %4926 = vmatprep.subr.bf16.mxu1 %v5402_v21  ;;  %v5453_v21 = vld [vmem:[%s7543_s7 + $0xe8] ss:$28 sps:$4 sm:$0xff]  }
 0x1c2   : > { %4927 = vmatpush3.bf16.msra.mxu1 %v5403_v22  ;;  %v5458_v22 = vld [vmem:[%s7543_s7 + $0x11c] ss:$28 sps:$4 sm:$0xff]  }
 0x1c3   : > { %4928 = vmatprep.subr.bf16.mxu1 %v5404_v24  ;;  %v5461_v24 = vld [vmem:[%s7543_s7 + $0x124] ss:$28 sps:$4 sm:$0xff]  }
 0x1c6   : > { %4929 = vmatpush3.bf16.msra.mxu1 %v5405_v25  ;;  %v5456_v25 = vld [vmem:[%s7543_s7 + $0x118] ss:$28 sps:$4 sm:$0xff]  }
 0x1c7   : > { %4930 = vmatprep.subr.bf16.mxu1 %v5406_v26  ;;  %v5459_v26 = vld [vmem:[%s7543_s7 + $0x120] ss:$28 sps:$4 sm:$0xff]  }
 0x1ca   : > { %4931 = vmatpush3.bf16.msra.mxu1 %v5407_v27  ;;  %v5464_v27 = vld [vmem:[%s7543_s7 + $0x154] ss:$28 sps:$4 sm:$0xff]  }
 0x1cb   : > { %4932 = vmatprep.subr.bf16.mxu1 %v5408_v28  ;;  %v5467_v28 = vld [vmem:[%s7543_s7 + $0x15c] ss:$28 sps:$4 sm:$0xff]  }
 0x1ce   : > { %4933 = vmatpush3.bf16.msra.mxu1 %v5409_v29  ;;  %v5462_v29 = vld [vmem:[%s7543_s7 + $0x150] ss:$28 sps:$4 sm:$0xff]  }
 0x1cf   : > { %4934 = vmatprep.subr.bf16.mxu1 %v5410_v30  ;;  %v5465_v30 = vld [vmem:[%s7543_s7 + $0x158] ss:$28 sps:$4 sm:$0xff]  }
 0x1d2   : > { %4935 = vmatpush3.bf16.msra.mxu1 %v5411_v31  ;;  %v5470_v31 = vld [vmem:[%s7543_s7 + $0x18c] ss:$28 sps:$4 sm:$0xff]  }
 0x1d3   : > { %4936 = vmatprep.subr.bf16.mxu1 %v5412_v32  ;;  %v5473_v32 = vld [vmem:[%s7543_s7 + $0x194] ss:$28 sps:$4 sm:$0xff]  }
 0x1d6   : > { %4937 = vmatpush3.bf16.msra.mxu1 %v5413_v33  ;;  %v5468_v33 = vld [vmem:[%s7543_s7 + $0x188] ss:$28 sps:$4 sm:$0xff]  }
 0x1d7   : > { %2412 = vmatprep.subr.bf16.mxu1 %v5419_v35  ;;  %v5476_v35 = vld [vmem:[%s7543_s7 + $0x1c4] ss:$28 sps:$4 sm:$0xff]  }
 0x1d9   : > { %2284 = vmatmul.mubr.bf16.vlgmr.msra.gmra.mrb[8].mxu1 %v1945_v15  ;;  %v5449_v15 = vld [vmem:[%s7543_s7 + $0xb4] ss:$28 sps:$4 sm:$0xff]  }
 0x1da   : > { %2444 = vmatprep.mubr.bf16.mxu1 %v5866_v23  ;;  %2413 = vmatpush1.bf16.msra.mxu1 %v5417_v37  ;;  %v5422_v23 = vld [vmem:[%s7541_s5 + $0x24] ss:$16 sps:$4 sm:$0xff]   ;;  %v5474_v37 = vld [vmem:[%s7543_s7 + $0x1c0] ss:$28 sps:$4 sm:$0xff]  }
 0x1db   : > { %2371 = vmatprep.subr.bf16.mxu0 %v5422_v23  ;;  %2414 = vmatprep.subr.bf16.mxu1 %v5425_v38  ;;  %v5477_v23 = vld [vmem:[%s7543_s7 + $0x1c8] ss:$28 sps:$4 sm:$0xff]   ;;  %v5482_v38 = vld [vmem:[%s7543_s7 + $0x1fc] ss:$28 sps:$4 sm:$0xff]  }
 0x1dc   : > { %2372 = vmatpush1.bf16.msra.mxu0 %v5420_v39  ;;  %v5485_v39 = vld [vmem:[%s7543_s7 + $0x204] ss:$28 sps:$4 sm:$0xff]  }
 0x1dd   : > { %3912 = vmatprep.subr.bf16.mxu0 %v5428_v41  ;;  %v5483_v41 = vld [vmem:[%s7543_s7 + $0x200] ss:$28 sps:$4 sm:$0xff]  }
 0x1de   : > { %2415 = vmatpush1.bf16.msra.mxu1 %v5423_v40  ;;  %v5480_v40 = vld [vmem:[%s7543_s7 + $0x1f8] ss:$28 sps:$4 sm:$0xff]  }
 0x1df   : > { %3998 = vmatprep.subr.bf16.mxu1 %v5431_v42  ;;  %v5488_v42 = vld [vmem:[%s7543_s7 + $0x234] ss:$28 sps:$4 sm:$0xff]  }
 0x28c   : > { %v4916_v43 = vpop.f32.mrb[4].mxu1 }
 0x28d   : > { %v4917_v47 = vpop.f32.mrb[5].mxu1 }
 0x28e   : > { %v4918_v50 = vadd.f32 %v4917_v47, %v4916_v43  ;;  %v4919_v51 = vpop.f32.mrb[6].mxu1  ;;  %v5491_v43 = vld [vmem:[%s7543_s7 + $0x23c] ss:$28 sps:$4 sm:$0xff]   ;;  %v5486_v47 = vld [vmem:[%s7543_s7 + $0x230] ss:$28 sps:$4 sm:$0xff]  }
 0x28f   : > { %v4920_v52 = vpop.f32.mrb[7].mxu1 }
 0x290   : > { %v4921_v53 = vadd.f32 %v4920_v52, %v4919_v51  ;;  %v2245_v57 = vadd.f32 %v4918_v50, %v4624_v54  ;;  %v5489_v50 = vld [vmem:[%s7543_s7 + $0x238] ss:$28 sps:$4 sm:$0xff]   ;;  %v5494_v51 = vld [vmem:[%s7543_s7 + $0x26c] ss:$28 sps:$4 sm:$0xff]  }
 0x291   : > { %v5497_v52 = vld [vmem:[%s7543_s7 + $0x274] ss:$28 sps:$4 sm:$0xff]  }
 0x292   : > { %v2248_v61 = vadd.f32 %v4921_v53, %v4624_v54  ;;  %v5492_v53 = vld [vmem:[%s7543_s7 + $0x268] ss:$28 sps:$4 sm:$0xff]   ;;  %v5495_v54 = vld [vmem:[%s7543_s7 + $0x270] ss:$28 sps:$4 sm:$0xff]  }
 0x2ac   : > { %v4938_v55 = vpop.f32.mrb[8].mxu1 }
 0x2ad   : > { %v4939_v56 = vpop.f32.mrb[9].mxu1 }
 0x2ae   : > { %v4940_v58 = vadd.f32 %v4939_v56, %v4938_v55  ;;  %v4941_v59 = vpop.f32.mrb[10].mxu1  ;;  %v5500_v55 = vld [vmem:[%s7543_s7 + $0x2a4] ss:$28 sps:$4 sm:$0xff]   ;;  %v5503_v56 = vld [vmem:[%s7543_s7 + $0x2ac] ss:$28 sps:$4 sm:$0xff]  }
 0x2af   : > { %v4942_v60 = vpop.f32.mrb[11].mxu1 }
 0x2b0   : > { %v2286_v62 = vadd.f32 %v4940_v58, %v2245_v57  ;;  %v4943_v63 = vadd.f32 %v4942_v60, %v4941_v59  ;;  %v5498_v57 = vld [vmem:[%s7543_s7 + $0x2a0] ss:$28 sps:$4 sm:$0xff]   ;;  %v5501_v58 = vld [vmem:[%s7543_s7 + $0x2a8] ss:$28 sps:$4 sm:$0xff]  }
 0x2b1   : > { %v5506_v59 = vld [vmem:[%s7543_s7 + $0x2dc] ss:$28 sps:$4 sm:$0xff]   ;;  %v5509_v60 = vld [vmem:[%s7543_s7 + $0x2e4] ss:$28 sps:$4 sm:$0xff]  }
 0x2b2   : > { %v2289_v0 = vadd.f32 %v4943_v63, %v2248_v61  ;;  %v2292_v1 = vmax.f32 %v2286_v62, 0.0  ;;  %v5504_v61 = vld [vmem:[%s7543_s7 + $0x2d8] ss:$28 sps:$4 sm:$0xff]   ;;  %v5507_v62 = vld [vmem:[%s7543_s7 + $0x2e0] ss:$28 sps:$4 sm:$0xff]  }
 0x2b3   : > { %v5512_v63 = vld [vmem:[%s7543_s7 + $0x314] ss:$28 sps:$4 sm:$0xff]  }
 0x2b4   : > { %v2293_v2 = vmax.f32 %v2289_v0, 0.0  ;;  %v5515_v0 = vld [vmem:[%s7543_s7 + $0x31c] ss:$28 sps:$4 sm:$0xff]  }
 0x2b6   : > { %v2294_v5 = vpack.c.bf16 %v2293_v2, %v2292_v1  ;;  %v5510_v1 = vld [vmem:[%s7543_s7 + $0x310] ss:$28 sps:$4 sm:$0xff]   ;;  %v5513_v2 = vld [vmem:[%s7543_s7 + $0x318] ss:$28 sps:$4 sm:$0xff]  }
 0x2b8   : > { %4665 = vmatmul.mubr.msk.bf16.vlgmr.msra.gmra.mrb[4].mxu0 %vm2365_vm1, %v2294_v5  ;;  %4666 = vmatmul.mubr.msk.bf16.vlgmr.msra.gmra.mrb[12].mxu1 %vm2365_vm1, %v2294_v5  ;;  %v5516_v5 = vld [vmem:[%s7543_s7 + $0x348] ss:$28 sps:$4 sm:$0xff]  }
 0x2b9   : > { %3913 = vmatpush1.bf16.msra.mxu0 %v5426_v3  ;;  %3999 = vmatpush1.bf16.msra.mxu1 %v5429_v4  ;;  %v5518_v3 = vld [vmem:[%s7543_s7 + $0x34c] ss:$28 sps:$4 sm:$0xff]   ;;  %v5521_v4 = vld [vmem:[%s7543_s7 + $0x354] ss:$28 sps:$4 sm:$0xff]  }
 0x2ba   : > { %3914 = vmatprep.subr.bf16.mxu0 %v5434_v6  ;;  %4000 = vmatprep.subr.bf16.mxu1 %v5437_v7  ;;  %v5519_v6 = vld [vmem:[%s7543_s7 + $0x350] ss:$28 sps:$4 sm:$0xff]   ;;  %v5524_v7 = vld [vmem:[%s7543_s7 + $0x384] ss:$28 sps:$4 sm:$0xff]  }
 0x2bd   : > { %3915 = vmatpush1.bf16.msra.mxu0 %v5432_v8  ;;  %4001 = vmatpush1.bf16.msra.mxu1 %v5435_v9  ;;  %v5527_v8 = vld [vmem:[%s7543_s7 + $0x38c] ss:$28 sps:$4 sm:$0xff]   ;;  %v2303_v9 = vld [vmem:[%s7542_s6] sm:$0xf] }
 0x2be   : > { %3916 = vmatprep.subr.bf16.mxu0 %v5440_v10  ;;  %4002 = vmatprep.subr.bf16.mxu1 %v5443_v11  ;;  %v2308_v10 = vrot.slane %v2303_v9, %v6639_v45  ;;  %v2316_v11 = vrot.slane %v2303_v9, %v6642_v46 }
 0x2c1   : > { %3917 = vmatpush1.bf16.msra.mxu0 %v5438_v12  ;;  %4003 = vmatpush1.bf16.msra.mxu1 %v5441_v13  ;;  %v2312_v12 = vrot.slane %v2303_v9, %v6648_v48  ;;  %v2320_v13 = vrot.slane %v2303_v9, %v6651_v49  ;;  %v5566_v9 = vld [vmem:[%s7543_s7 + $0x50c] ss:$28 sps:$4 sm:$0xff]  }
 0x2c2   : > { %3918 = vmatprep.subr.bf16.mxu0 %v5446_v14  ;;  %4004 = vmatprep.subr.bf16.mxu1 %v5449_v15 }
 0x2c5   : > { %3919 = vmatpush1.bf16.msra.mxu0 %v5444_v16  ;;  %4005 = vmatpush1.bf16.msra.mxu1 %v5447_v17 }
 0x2c6   : > { %3920 = vmatprep.subr.bf16.mxu0 %v5452_v18  ;;  %4006 = vmatprep.subr.bf16.mxu1 %v5455_v19 }
 0x2c9   : > { %3921 = vmatpush1.bf16.msra.mxu0 %v5450_v20  ;;  %4007 = vmatpush1.bf16.msra.mxu1 %v5453_v21 }
 0x2ca   : > { %3922 = vmatprep.subr.bf16.mxu0 %v5458_v22  ;;  %4008 = vmatprep.subr.bf16.mxu1 %v5461_v24 }
 0x2cd   : > { %3923 = vmatpush1.bf16.msra.mxu0 %v5456_v25  ;;  %4009 = vmatpush1.bf16.msra.mxu1 %v5459_v26 }
 0x2ce   : > { %3924 = vmatprep.subr.bf16.mxu0 %v5464_v27  ;;  %4010 = vmatprep.subr.bf16.mxu1 %v5467_v28 }
 0x2d1   : > { %3925 = vmatpush1.bf16.msra.mxu0 %v5462_v29  ;;  %4011 = vmatpush1.bf16.msra.mxu1 %v5465_v30 }
 0x2d2   : > { %3926 = vmatprep.subr.bf16.mxu0 %v5470_v31  ;;  %4012 = vmatprep.subr.bf16.mxu1 %v5473_v32 }
 0x2d5   : > { %3927 = vmatpush1.bf16.msra.mxu0 %v5468_v33  ;;  %4013 = vmatpush1.bf16.msra.mxu1 %v5471_v34 }
 0x2d6   : > { %3928 = vmatprep.subr.bf16.mxu0 %v5476_v35  ;;  %4014 = vmatprep.subr.bf16.mxu1 %v5479_v36 }
 0x2d9   : > { %3929 = vmatpush1.bf16.msra.mxu0 %v5474_v37  ;;  %4015 = vmatpush1.bf16.msra.mxu1 %v5477_v23 }
 0x2da   : > { %3930 = vmatprep.subr.bf16.mxu0 %v5482_v38  ;;  %4016 = vmatprep.subr.bf16.mxu1 %v5485_v39 }
 0x2dd   : > { %3931 = vmatpush1.bf16.msra.mxu0 %v5480_v40  ;;  %4017 = vmatpush1.bf16.msra.mxu1 %v5483_v41 }
 0x2de   : > { %3932 = vmatprep.subr.bf16.mxu0 %v5488_v42  ;;  %4018 = vmatprep.subr.bf16.mxu1 %v5491_v43  ;;  %v5522_v42 = vld [vmem:[%s7543_s7 + $0x380] ss:$28 sps:$4 sm:$0xff]   ;;  %v5525_v43 = vld [vmem:[%s7543_s7 + $0x388] ss:$28 sps:$4 sm:$0xff]  }
 0x2e1   : > { %3933 = vmatpush1.bf16.msra.mxu0 %v5486_v47  ;;  %4019 = vmatpush1.bf16.msra.mxu1 %v5489_v50  ;;  %v5530_v47 = vld [vmem:[%s7543_s7 + $0x3bc] ss:$28 sps:$4 sm:$0xff]   ;;  %v5533_v50 = vld [vmem:[%s7543_s7 + $0x3c4] ss:$28 sps:$4 sm:$0xff]  }
 0x2e2   : > { %3934 = vmatprep.subr.bf16.mxu0 %v5494_v51  ;;  %4020 = vmatprep.subr.bf16.mxu1 %v5497_v52  ;;  %v5528_v51 = vld [vmem:[%s7543_s7 + $0x3b8] ss:$28 sps:$4 sm:$0xff]   ;;  %v5531_v52 = vld [vmem:[%s7543_s7 + $0x3c0] ss:$28 sps:$4 sm:$0xff]  }
 0x2e5   : > { %3935 = vmatpush1.bf16.msra.mxu0 %v5492_v53  ;;  %4021 = vmatpush1.bf16.msra.mxu1 %v5495_v54  ;;  %v5536_v53 = vld [vmem:[%s7543_s7 + $0x3f4] ss:$28 sps:$4 sm:$0xff]   ;;  %v5539_v54 = vld [vmem:[%s7543_s7 + $0x3fc] ss:$28 sps:$4 sm:$0xff]  }
 0x2e6   : > { %3936 = vmatprep.subr.bf16.mxu0 %v5500_v55  ;;  %4022 = vmatprep.subr.bf16.mxu1 %v5503_v56  ;;  %v5534_v55 = vld [vmem:[%s7543_s7 + $0x3f0] ss:$28 sps:$4 sm:$0xff]   ;;  %v5537_v56 = vld [vmem:[%s7543_s7 + $0x3f8] ss:$28 sps:$4 sm:$0xff]  }
 0x2e9   : > { %3937 = vmatpush1.bf16.msra.mxu0 %v5498_v57  ;;  %4023 = vmatpush1.bf16.msra.mxu1 %v5501_v58  ;;  %v5542_v57 = vld [vmem:[%s7543_s7 + $0x42c] ss:$28 sps:$4 sm:$0xff]   ;;  %v5545_v58 = vld [vmem:[%s7543_s7 + $0x434] ss:$28 sps:$4 sm:$0xff]  }
 0x2ea   : > { %3938 = vmatprep.subr.bf16.mxu0 %v5506_v59  ;;  %4024 = vmatprep.subr.bf16.mxu1 %v5509_v60  ;;  %v5540_v59 = vld [vmem:[%s7543_s7 + $0x428] ss:$28 sps:$4 sm:$0xff]   ;;  %v5543_v60 = vld [vmem:[%s7543_s7 + $0x430] ss:$28 sps:$4 sm:$0xff]  }
 0x2ed   : > { %3939 = vmatpush1.bf16.msra.mxu0 %v5504_v61  ;;  %4025 = vmatpush1.bf16.msra.mxu1 %v5507_v62  ;;  %v5548_v61 = vld [vmem:[%s7543_s7 + $0x464] ss:$28 sps:$4 sm:$0xff]   ;;  %v5551_v62 = vld [vmem:[%s7543_s7 + $0x46c] ss:$28 sps:$4 sm:$0xff]  }
 0x2ee   : > { %3940 = vmatprep.subr.bf16.mxu0 %v5512_v63  ;;  %4026 = vmatprep.subr.bf16.mxu1 %v5515_v0  ;;  %v5546_v63 = vld [vmem:[%s7543_s7 + $0x460] ss:$28 sps:$4 sm:$0xff]   ;;  %v5549_v0 = vld [vmem:[%s7543_s7 + $0x468] ss:$28 sps:$4 sm:$0xff]  }
 0x2f1   : > { %3941 = vmatpush1.bf16.msra.mxu0 %v5510_v1  ;;  %4027 = vmatpush1.bf16.msra.mxu1 %v5513_v2  ;;  %v5554_v1 = vld [vmem:[%s7543_s7 + $0x49c] ss:$28 sps:$4 sm:$0xff]   ;;  %v5557_v2 = vld [vmem:[%s7543_s7 + $0x4a4] ss:$28 sps:$4 sm:$0xff]  }
 0x2f2   : > { %3942 = vmatprep.subr.bf16.mxu0 %v5518_v3  ;;  %4028 = vmatprep.subr.bf16.mxu1 %v5521_v4  ;;  %v5552_v3 = vld [vmem:[%s7543_s7 + $0x498] ss:$28 sps:$4 sm:$0xff]   ;;  %v5555_v4 = vld [vmem:[%s7543_s7 + $0x4a0] ss:$28 sps:$4 sm:$0xff]  }
 0x2f5   : > { %3943 = vmatpush1.bf16.msra.mxu0 %v5516_v5  ;;  %4029 = vmatpush1.bf16.msra.mxu1 %v5519_v6  ;;  %v5560_v5 = vld [vmem:[%s7543_s7 + $0x4d4] ss:$28 sps:$4 sm:$0xff]   ;;  %v5563_v6 = vld [vmem:[%s7543_s7 + $0x4dc] ss:$28 sps:$4 sm:$0xff]  }
 0x2f6   : > { %3955 = vmatprep.subr.bf16.mxu0 %v5524_v7  ;;  %4041 = vmatprep.subr.bf16.mxu1 %v5527_v8  ;;  %v5558_v7 = vld [vmem:[%s7543_s7 + $0x4d0] ss:$28 sps:$4 sm:$0xff]   ;;  %v5561_v8 = vld [vmem:[%s7543_s7 + $0x4d8] ss:$28 sps:$4 sm:$0xff]  }
 0x38b   : > { %v2403_v14 = vpop.f32.mrb[4].mxu0  ;;  %v2446_v15 = vpop.f32.mrb[12].mxu1 }
 0x38c   : > { %v2404_v16 = vadd.f32 %v2403_v14, %v2308_v10  ;;  %v2447_v17 = vadd.f32 %v2446_v15, %v2316_v11  ;;  %v2405_v18 = vpop.f32.mrb[5].mxu0  ;;  %v2448_v19 = vpop.f32.mrb[13].mxu1  ;;  %v5575_v14 = vld [vmem:[%s7543_s7 + $0x54c] ss:$28 sps:$4 sm:$0xff]   ;;  %v5570_v15 = vld [vmem:[%s7543_s7 + $0x540] ss:$28 sps:$4 sm:$0xff]  }
 0x38d   : > { %v2406_v20 = vadd.f32 %v2405_v18, %v2312_v12  ;;  %v2449_v21 = vadd.f32 %v2448_v19, %v2320_v13  ;;  %v2407_v22 = vpop.f32.mrb[6].mxu0  ;;  %v2450_v24 = vpop.f32.mrb[14].mxu1  ;;  %v5581_v18 = vld [vmem:[%s7543_s7 + $0x584] ss:$28 sps:$4 sm:$0xff]   ;;  %v5576_v19 = vld [vmem:[%s7543_s7 + $0x578] ss:$28 sps:$4 sm:$0xff]  }
 0x38e   : > { %v2408_v25 = vadd.f32 %v2407_v22, %v2308_v10  ;;  %v2451_v26 = vadd.f32 %v2450_v24, %v2316_v11  ;;  %v2409_v27 = vpop.f32.mrb[7].mxu0  ;;  %v2452_v28 = vpop.f32.mrb[15].mxu1  ;;  %v2455_v31 = vmax.f32 %v2404_v16, 0.0  ;;  %v2457_v32 = vmax.f32 %v2447_v17, 0.0  ;;  %v5569_v10 = vld [vmem:[%s7543_s7 + $0x514] ss:$28 sps:$4 sm:$0xff]  }
 0x38f   : > { %v2410_v29 = vadd.f32 %v2409_v27, %v2312_v12  ;;  %v2453_v30 = vadd.f32 %v2452_v28, %v2320_v13  ;;  %v2456_v35 = vmax.f32 %v2406_v20, 0.0  ;;  %v2458_v36 = vmax.f32 %v2449_v21, 0.0  ;;  %v5564_v11 = vld [vmem:[%s7543_s7 + $0x508] ss:$28 sps:$4 sm:$0xff]   ;;  %v5567_v12 = vld [vmem:[%s7543_s7 + $0x510] ss:$28 sps:$4 sm:$0xff]  }
 0x390   : > { %v2459_v33 = vmax.f32 %v2408_v25, 0.0  ;;  %v2461_v34 = vmax.f32 %v2451_v26, 0.0  ;;  %v5572_v13 = vld [vmem:[%s7543_s7 + $0x544] ss:$28 sps:$4 sm:$0xff]   ;;  %v5578_v17 = vld [vmem:[%s7543_s7 + $0x57c] ss:$28 sps:$4 sm:$0xff]  }
 0x391   : > { %v2460_v37 = vmax.f32 %v2410_v29, 0.0  ;;  %v2462_v23 = vmax.f32 %v2453_v30, 0.0  ;;  %v5573_v16 = vld [vmem:[%s7543_s7 + $0x548] ss:$28 sps:$4 sm:$0xff]   ;;  %v5579_v20 = vld [vmem:[%s7543_s7 + $0x580] ss:$28 sps:$4 sm:$0xff]  }
 0x392   : > { %v6935_v38 = vpack.c.bf16 %v2459_v33, %v2455_v31  ;;  %v6937_v39 = vpack.c.bf16 %v2461_v34, %v2457_v32  ;;  %v5584_v21 = vld [vmem:[%s7543_s7 + $0x5b4] ss:$28 sps:$4 sm:$0xff]   ;;  %v5587_v22 = vld [vmem:[%s7543_s7 + $0x5bc] ss:$28 sps:$4 sm:$0xff]   ;;  %v5590_v26 = vld [vmem:[%s7543_s7 + $0x5ec] ss:$28 sps:$4 sm:$0xff]  }
 0x393   : > { %v6939_v40 = vpack.c.bf16 %v2460_v37, %v2456_v35  ;;  %v6941_v41 = vpack.c.bf16 %v2462_v23, %v2458_v36  ;;  %v5582_v24 = vld [vmem:[%s7543_s7 + $0x5b0] ss:$28 sps:$4 sm:$0xff]   ;;  %v5585_v25 = vld [vmem:[%s7543_s7 + $0x5b8] ss:$28 sps:$4 sm:$0xff]   ;;  %v5588_v28 = vld [vmem:[%s7543_s7 + $0x5e8] ss:$28 sps:$4 sm:$0xff]  }
 0x394   : > { %v5593_v27 = vld [vmem:[%s7543_s7 + $0x5f4] ss:$28 sps:$4 sm:$0xff]   ;;  %v5596_v30 = vld [vmem:[%s7543_s7 + $0x624] ss:$28 sps:$4 sm:$0xff]   ;;  %v5599_v31 = vld [vmem:[%s7543_s7 + $0x62c] ss:$28 sps:$4 sm:$0xff]  }
 0x395   : > { %3944 = vmatprep.mubr.bf16.mxu0 %v6939_v40  ;;  %4030 = vmatprep.mubr.bf16.mxu1 %v6939_v40  ;;  %v5591_v29 = vld [vmem:[%s7543_s7 + $0x5f0] ss:$28 sps:$4 sm:$0xff]   ;;  %v5594_v32 = vld [vmem:[%s7543_s7 + $0x620] ss:$28 sps:$4 sm:$0xff]   ;;  %v5597_v33 = vld [vmem:[%s7543_s7 + $0x628] ss:$28 sps:$4 sm:$0xff]  }
 0x396   : > { %3945 = vmatmul.mubr.bf16.vlgmr.msra.gmra.mrb[8].mxu0 %v6935_v38  ;;  %4031 = vmatmul.mubr.bf16.vlgmr.msra.gmra.mrb[16].mxu1 %v6935_v38  ;;  %v5602_v34 = vld [vmem:[%s7543_s7 + $0x65c] ss:$28 sps:$4 sm:$0xff]   ;;  %v5605_v35 = vld [vmem:[%s7543_s7 + $0x664] ss:$28 sps:$4 sm:$0xff]   ;;  %v5608_v23 = vld [vmem:[%s7543_s7 + $0x694] ss:$28 sps:$4 sm:$0xff]  }
 0x397   : > { %3956 = vmatpush1.bf16.msra.mxu0 %v5522_v42  ;;  %4042 = vmatpush1.bf16.msra.mxu1 %v5525_v43  ;;  %v5600_v36 = vld [vmem:[%s7543_s7 + $0x658] ss:$28 sps:$4 sm:$0xff]   ;;  %v5603_v37 = vld [vmem:[%s7543_s7 + $0x660] ss:$28 sps:$4 sm:$0xff]   ;;  %v5606_v43 = vld [vmem:[%s7543_s7 + $0x690] ss:$28 sps:$4 sm:$0xff]  }
 0x398   : > { %3987 = vmatprep.mubr.bf16.mxu0 %v6941_v41  ;;  %4073 = vmatprep.mubr.bf16.mxu1 %v6941_v41  ;;  %v5611_v42 = vld [vmem:[%s7543_s7 + $0x69c] ss:$28 sps:$4 sm:$0xff]  }
 0x399   : > { %3957 = vmatprep.subr.bf16.mxu0 %v5530_v47  ;;  %4043 = vmatprep.subr.bf16.mxu1 %v5533_v50  ;;  %v5609_v47 = vld [vmem:[%s7543_s7 + $0x698] ss:$28 sps:$4 sm:$0xff]   ;;  %v5614_v50 = vld [vmem:[%s7543_s7 + $0x6cc] ss:$28 sps:$4 sm:$0xff]  }
 0x39b   : > { %3958 = vmatpush1.bf16.msra.mxu0 %v5528_v51  ;;  %4044 = vmatpush1.bf16.msra.mxu1 %v5531_v52  ;;  %v5617_v51 = vld [vmem:[%s7543_s7 + $0x6d4] ss:$28 sps:$4 sm:$0xff]   ;;  %v5612_v52 = vld [vmem:[%s7543_s7 + $0x6c8] ss:$28 sps:$4 sm:$0xff]  }
 0x39c   : > { %3959 = vmatprep.subr.bf16.mxu0 %v5536_v53  ;;  %4045 = vmatprep.subr.bf16.mxu1 %v5539_v54  ;;  %v5615_v53 = vld [vmem:[%s7543_s7 + $0x6d0] ss:$28 sps:$4 sm:$0xff]  }
 0x39d   : > { %v5620_v54 = vld [vmem:[%s7543_s7 + $0x14] ss:$28 sps:$4 sm:$0xff]  }
 0x39f   : > { %3960 = vmatpush1.bf16.msra.mxu0 %v5534_v55  ;;  %4046 = vmatpush1.bf16.msra.mxu1 %v5537_v56  ;;  %v5621_v55 = vld [vmem:[%s7543_s7 + $0x1d8] ss:$28 sps:$4 sm:$0xff]   ;;  %v5618_v56 = vld [vmem:[%s7543_s7 + $0x10] ss:$28 sps:$4 sm:$0xff]  }
 0x3a0   : > { %3961 = vmatprep.subr.bf16.mxu0 %v5542_v57  ;;  %4047 = vmatprep.subr.bf16.mxu1 %v5545_v58  ;;  %v5622_v57 = vld [vmem:[%s7543_s7 + $0x18] ss:$28 sps:$4 sm:$0xff]   ;;  %v5625_v58 = vld [vmem:[%s7543_s7 + $0x4c] ss:$28 sps:$4 sm:$0xff]  }
 0x3a3   : > { %3962 = vmatpush1.bf16.msra.mxu0 %v5540_v59  ;;  %4048 = vmatpush1.bf16.msra.mxu1 %v5543_v60  ;;  %v5626_v59 = vld [vmem:[%s7543_s7 + $0x210] ss:$28 sps:$4 sm:$0xff]   ;;  %v5623_v60 = vld [vmem:[%s7543_s7 + $0x48] ss:$28 sps:$4 sm:$0xff]  }
 0x3a4   : > { %3963 = vmatprep.subr.bf16.mxu0 %v5548_v61  ;;  %4049 = vmatprep.subr.bf16.mxu1 %v5551_v62  ;;  %v5627_v61 = vld [vmem:[%s7543_s7 + $0x50] ss:$28 sps:$4 sm:$0xff]   ;;  %v5630_v62 = vld [vmem:[%s7543_s7 + $0x84] ss:$28 sps:$4 sm:$0xff]  }
 0x3a7   : > { %3964 = vmatpush1.bf16.msra.mxu0 %v5546_v63  ;;  %4050 = vmatpush1.bf16.msra.mxu1 %v5549_v0  ;;  %v5631_v63 = vld [vmem:[%s7543_s7 + $0x248] ss:$28 sps:$4 sm:$0xff]   ;;  %v5628_v0 = vld [vmem:[%s7543_s7 + $0x80] ss:$28 sps:$4 sm:$0xff]  }
 0x3a8   : > { %3965 = vmatprep.subr.bf16.mxu0 %v5554_v1  ;;  %4051 = vmatprep.subr.bf16.mxu1 %v5557_v2  ;;  %v5635_v1 = vld [vmem:[%s7543_s7 + $0xbc] ss:$28 sps:$4 sm:$0xff]  }
 0x3a9   : > { %v5636_v2 = vld [vmem:[%s7543_s7 + $0x280] ss:$28 sps:$4 sm:$0xff]  }
 0x3ab   : > { %3966 = vmatpush1.bf16.msra.mxu0 %v5552_v3  ;;  %4052 = vmatpush1.bf16.msra.mxu1 %v5555_v4  ;;  %v5633_v3 = vld [vmem:[%s7543_s7 + $0xb8] ss:$28 sps:$4 sm:$0xff]   ;;  %v5637_v4 = vld [vmem:[%s7543_s7 + $0xc0] ss:$28 sps:$4 sm:$0xff]  }
 0x3ac   : > { %3967 = vmatprep.subr.bf16.mxu0 %v5560_v5  ;;  %4053 = vmatprep.subr.bf16.mxu1 %v5563_v6  ;;  %v5640_v5 = vld [vmem:[%s7543_s7 + $0xf4] ss:$28 sps:$4 sm:$0xff]  }
 0x3ad   : > { %v5641_v6 = vld [vmem:[%s7543_s7 + $0x2b8] ss:$28 sps:$4 sm:$0xff]  }
 0x3af   : > { %3968 = vmatpush1.bf16.msra.mxu0 %v5558_v7  ;;  %4054 = vmatpush1.bf16.msra.mxu1 %v5561_v8  ;;  %v5638_v7 = vld [vmem:[%s7543_s7 + $0xf0] ss:$28 sps:$4 sm:$0xff]   ;;  %v5642_v8 = vld [vmem:[%s7543_s7 + $0xf8] ss:$28 sps:$4 sm:$0xff]  }
 0x3b0   : > { %3969 = vmatprep.subr.bf16.mxu0 %v5566_v9  ;;  %4055 = vmatprep.subr.bf16.mxu1 %v5569_v10  ;;  %v5645_v9 = vld [vmem:[%s7543_s7 + $0x12c] ss:$28 sps:$4 sm:$0xff]  }
 0x3b1   : > { %v5646_v10 = vld [vmem:[%s7543_s7 + $0x2f0] ss:$28 sps:$4 sm:$0xff]  }
 0x3b3   : > { %3970 = vmatpush1.bf16.msra.mxu0 %v5564_v11  ;;  %4056 = vmatpush1.bf16.msra.mxu1 %v5567_v12  ;;  %v5643_v11 = vld [vmem:[%s7543_s7 + $0x128] ss:$28 sps:$4 sm:$0xff]   ;;  %v5647_v12 = vld [vmem:[%s7543_s7 + $0x130] ss:$28 sps:$4 sm:$0xff]  }
 0x3b4   : > { %3971 = vmatprep.subr.bf16.mxu0 %v5572_v13  ;;  %4057 = vmatprep.subr.bf16.mxu1 %v5575_v14  ;;  %v5650_v13 = vld [vmem:[%s7543_s7 + $0x164] ss:$28 sps:$4 sm:$0xff]  }
 0x3b5   : > { %v5651_v14 = vld [vmem:[%s7543_s7 + $0x328] ss:$28 sps:$4 sm:$0xff]  }
 0x3b7   : > { %3972 = vmatpush1.bf16.msra.mxu0 %v5570_v15  ;;  %4058 = vmatpush1.bf16.msra.mxu1 %v5573_v16  ;;  %v5648_v15 = vld [vmem:[%s7543_s7 + $0x160] ss:$28 sps:$4 sm:$0xff]   ;;  %v5652_v16 = vld [vmem:[%s7543_s7 + $0x168] ss:$28 sps:$4 sm:$0xff]  }
 0x3b8   : > { %3973 = vmatprep.subr.bf16.mxu0 %v5578_v17  ;;  %4059 = vmatprep.subr.bf16.mxu1 %v5581_v18  ;;  %v5655_v17 = vld [vmem:[%s7543_s7 + $0x19c] ss:$28 sps:$4 sm:$0xff]  }
 0x3b9   : > { %v5656_v18 = vld [vmem:[%s7543_s7 + $0x360] ss:$28 sps:$4 sm:$0xff]  }
 0x3bb   : > { %3974 = vmatpush1.bf16.msra.mxu0 %v5576_v19  ;;  %4060 = vmatpush1.bf16.msra.mxu1 %v5579_v20  ;;  %v5653_v19 = vld [vmem:[%s7543_s7 + $0x198] ss:$28 sps:$4 sm:$0xff]   ;;  %v5657_v20 = vld [vmem:[%s7543_s7 + $0x1a0] ss:$28 sps:$4 sm:$0xff]  }
 0x3bc   : > { %3975 = vmatprep.subr.bf16.mxu0 %v5584_v21  ;;  %4061 = vmatprep.subr.bf16.mxu1 %v5587_v22  ;;  %v5660_v21 = vld [vmem:[%s7543_s7 + $0x1d4] ss:$28 sps:$4 sm:$0xff]  }
 0x3bd   : > { %v5661_v22 = vld [vmem:[%s7543_s7 + $0x558] ss:$28 sps:$4 sm:$0xff]  }
 0x3bf   : > { %3976 = vmatpush1.bf16.msra.mxu0 %v5582_v24  ;;  %4062 = vmatpush1.bf16.msra.mxu1 %v5585_v25  ;;  %v5658_v24 = vld [vmem:[%s7543_s7 + $0x1d0] ss:$28 sps:$4 sm:$0xff]   ;;  %v5662_v25 = vld [vmem:[%s7543_s7 + $0x398] ss:$28 sps:$4 sm:$0xff]  }
 0x3c0   : > { %3977 = vmatprep.subr.bf16.mxu0 %v5590_v26  ;;  %4063 = vmatprep.subr.bf16.mxu1 %v5593_v27  ;;  %v5665_v26 = vld [vmem:[%s7543_s7 + $0x20c] ss:$28 sps:$4 sm:$0xff]  }
 0x3c1   : > { %v5666_v27 = vld [vmem:[%s7543_s7 + $0x590] ss:$28 sps:$4 sm:$0xff]  }
 0x3c3   : > { %3978 = vmatpush1.bf16.msra.mxu0 %v5588_v28  ;;  %4064 = vmatpush1.bf16.msra.mxu1 %v5591_v29  ;;  %v5663_v28 = vld [vmem:[%s7543_s7 + $0x208] ss:$28 sps:$4 sm:$0xff]   ;;  %v5667_v29 = vld [vmem:[%s7543_s7 + $0x3d0] ss:$28 sps:$4 sm:$0xff]  }
 0x3c4   : > { %3979 = vmatprep.subr.bf16.mxu0 %v5596_v30  ;;  %4065 = vmatprep.subr.bf16.mxu1 %v5599_v31  ;;  %v5670_v30 = vld [vmem:[%s7543_s7 + $0x244] ss:$28 sps:$4 sm:$0xff]  }
 0x3c5   : > { %v5671_v31 = vld [vmem:[%s7543_s7 + $0x5c8] ss:$28 sps:$4 sm:$0xff]  }
 0x3c7   : > { %3980 = vmatpush1.bf16.msra.mxu0 %v5594_v32  ;;  %4066 = vmatpush1.bf16.msra.mxu1 %v5597_v33  ;;  %v5668_v32 = vld [vmem:[%s7543_s7 + $0x240] ss:$28 sps:$4 sm:$0xff]   ;;  %v5672_v33 = vld [vmem:[%s7543_s7 + $0x408] ss:$28 sps:$4 sm:$0xff]  }
 0x3c8   : > { %3981 = vmatprep.subr.bf16.mxu0 %v5602_v34  ;;  %4067 = vmatprep.subr.bf16.mxu1 %v5605_v35  ;;  %v5675_v34 = vld [vmem:[%s7543_s7 + $0x27c] ss:$28 sps:$4 sm:$0xff]  }
 0x3c9   : > { %v5676_v35 = vld [vmem:[%s7543_s7 + $0x600] ss:$28 sps:$4 sm:$0xff]  }
 0x3cb   : > { %3982 = vmatpush1.bf16.msra.mxu0 %v5600_v36  ;;  %4068 = vmatpush1.bf16.msra.mxu1 %v5603_v37  ;;  %v5673_v36 = vld [vmem:[%s7543_s7 + $0x278] ss:$28 sps:$4 sm:$0xff]   ;;  %v5677_v37 = vld [vmem:[%s7543_s7 + $0x440] ss:$28 sps:$4 sm:$0xff]  }
 0x3cc   : > { %3983 = vmatprep.subr.bf16.mxu0 %v5608_v23  ;;  %4069 = vmatprep.subr.bf16.mxu1 %v5611_v42  ;;  %v5680_v23 = vld [vmem:[%s7543_s7 + $0x2b4] ss:$28 sps:$4 sm:$0xff]  }
 0x3cd   : > { %v5681_v42 = vld [vmem:[%s7543_s7 + $0x638] ss:$28 sps:$4 sm:$0xff]  }
 0x3cf   : > { %3984 = vmatpush1.bf16.msra.mxu0 %v5606_v43  ;;  %4070 = vmatpush1.bf16.msra.mxu1 %v5609_v47  ;;  %v5678_v43 = vld [vmem:[%s7543_s7 + $0x2b0] ss:$28 sps:$4 sm:$0xff]   ;;  %v5682_v47 = vld [vmem:[%s7543_s7 + $0x478] ss:$28 sps:$4 sm:$0xff]  }
 0x3d0   : > { %3985 = vmatprep.subr.bf16.mxu0 %v5614_v50  ;;  %4071 = vmatprep.subr.bf16.mxu1 %v5617_v51  ;;  %v5685_v50 = vld [vmem:[%s7543_s7 + $0x2ec] ss:$28 sps:$4 sm:$0xff]  }
 0x3d1   : > { %v5686_v51 = vld [vmem:[%s7543_s7 + $0x670] ss:$28 sps:$4 sm:$0xff]  }
 0x3d3   : > { %3986 = vmatpush1.bf16.msra.mxu0 %v5612_v52  ;;  %4072 = vmatpush1.bf16.msra.mxu1 %v5615_v53  ;;  %v5683_v52 = vld [vmem:[%s7543_s7 + $0x2e8] ss:$28 sps:$4 sm:$0xff]   ;;  %v5687_v53 = vld [vmem:[%s7543_s7 + $0x4b0] ss:$28 sps:$4 sm:$0xff]  }
 0x3d4   : > { %4084 = vmatprep.subr.bf16.mxu0 %v5620_v54  ;;  %4944 = vmatprep.subr.bf16.mxu1 %v5621_v55  ;;  %v5690_v54 = vld [vmem:[%s7543_s7 + $0x324] ss:$28 sps:$4 sm:$0xff]  }
 0x3d5   : > { %v5691_v55 = vld [vmem:[%s7543_s7 + $0x6a8] ss:$28 sps:$4 sm:$0xff]  }
 0x3d6   : > { %3988 = vmatmul.mubr.bf16.vlgmr.msra.gmra.mrb[8].mxu0 %v6937_v39  ;;  %4074 = vmatmul.mubr.bf16.vlgmr.msra.gmra.mrb[16].mxu1 %v6937_v39 }
 0x3d7   : > { %4085 = vmatpush1.bf16.msra.mxu0 %v5618_v56  ;;  %4116 = vmatprep.mubr.bf16.mxu0 %v6939_v40  ;;  %v5688_v56 = vld [vmem:[%s7543_s7 + $0x320] ss:$28 sps:$4 sm:$0xff]  }
 0x3d8   : > { %4945 = vmatpush3.bf16.msra.mxu1 %v5622_v57  ;;  %4202 = vmatprep.mubr.bf16.mxu1 %v6939_v40  ;;  %v5632_v40 = vld [vmem:[%s7543_s7 + $0x88] ss:$28 sps:$4 sm:$0xff]  }
 0x3d9   : > { %4086 = vmatprep.subr.bf16.mxu0 %v5625_v58  ;;  %4946 = vmatprep.subr.bf16.mxu1 %v5626_v59  ;;  %v5692_v57 = vld [vmem:[%s7543_s7 + $0x4e8] ss:$28 sps:$4 sm:$0xff]   ;;  %v5695_v58 = vld [vmem:[%s7543_s7 + $0x35c] ss:$28 sps:$4 sm:$0xff]  }
 0x3da   : > { %v5696_v59 = vld [vmem:[%s7543_s7 + $0x6e0] ss:$28 sps:$4 sm:$0xff]  }
 0x3db   : > { %4087 = vmatpush1.bf16.msra.mxu0 %v5623_v60  ;;  %v5693_v60 = vld [vmem:[%s7543_s7 + $0x358] ss:$28 sps:$4 sm:$0xff]  }
 0x3dc   : > { %4947 = vmatpush3.bf16.msra.mxu1 %v5627_v61  ;;  %4088 = vmatprep.subr.bf16.mxu0 %v5630_v62  ;;  %v5697_v61 = vld [vmem:[%s7543_s7 + $0x520] ss:$28 sps:$4 sm:$0xff]   ;;  %v5700_v62 = vld [vmem:[%s7543_s7 + $0x394] ss:$28 sps:$4 sm:$0xff]  }
 0x3dd   : > { %4948 = vmatprep.subr.bf16.mxu1 %v5631_v63  ;;  %v5698_v63 = vld [vmem:[%s7543_s7 + $0x390] ss:$28 sps:$4 sm:$0xff]  }
 0x3df   : > { %4089 = vmatpush1.bf16.msra.mxu0 %v5628_v0  ;;  %v5703_v0 = vld [vmem:[%s7543_s7 + $0x3cc] ss:$28 sps:$4 sm:$0xff]  }
 0x3e0   : > { %4949 = vmatpush3.bf16.msra.mxu1 %v5632_v40  ;;  %4090 = vmatprep.subr.bf16.mxu0 %v5635_v1  ;;  %v5701_v40 = vld [vmem:[%s7543_s7 + $0x3c8] ss:$28 sps:$4 sm:$0xff]  }
 0x3e1   : > { %4950 = vmatprep.subr.bf16.mxu1 %v5636_v2  ;;  %v5706_v1 = vld [vmem:[%s7543_s7 + $0x404] ss:$28 sps:$4 sm:$0xff]  }
 0x3e2   : > { %v5704_v2 = vld [vmem:[%s7543_s7 + $0x400] ss:$28 sps:$4 sm:$0xff]  }
 0x3e3   : > { %4091 = vmatpush1.bf16.msra.mxu0 %v5633_v3  ;;  %v5712_v3 = vld [vmem:[%s7543_s7 + $0x474] ss:$28 sps:$4 sm:$0xff]  }
 0x3e4   : > { %4951 = vmatpush3.bf16.msra.mxu1 %v5637_v4  ;;  %4092 = vmatprep.subr.bf16.mxu0 %v5640_v5  ;;  %v5710_v4 = vld [vmem:[%s7543_s7 + $0x470] ss:$28 sps:$4 sm:$0xff]  }
 0x3e5   : > { %4952 = vmatprep.subr.bf16.mxu1 %v5641_v6  ;;  %v5715_v5 = vld [vmem:[%s7543_s7 + $0x4ac] ss:$28 sps:$4 sm:$0xff]  }
 0x3e6   : > { %v5713_v6 = vld [vmem:[%s7543_s7 + $0x4a8] ss:$28 sps:$4 sm:$0xff]  }
 0x3e7   : > { %4093 = vmatpush1.bf16.msra.mxu0 %v5638_v7  ;;  %v5718_v7 = vld [vmem:[%s7543_s7 + $0x4e4] ss:$28 sps:$4 sm:$0xff]  }
 0x3e8   : > { %4953 = vmatpush3.bf16.msra.mxu1 %v5642_v8  ;;  %4094 = vmatprep.subr.bf16.mxu0 %v5645_v9  ;;  %v5716_v8 = vld [vmem:[%s7543_s7 + $0x4e0] ss:$28 sps:$4 sm:$0xff]  }
 0x3e9   : > { %4954 = vmatprep.subr.bf16.mxu1 %v5646_v10  ;;  %v5721_v9 = vld [vmem:[%s7543_s7 + $0x51c] ss:$28 sps:$4 sm:$0xff]  }
 0x3ea   : > { %v5719_v10 = vld [vmem:[%s7543_s7 + $0x518] ss:$28 sps:$4 sm:$0xff]  }
 0x3eb   : > { %4095 = vmatpush1.bf16.msra.mxu0 %v5643_v11  ;;  %v5724_v11 = vld [vmem:[%s7543_s7 + $0x554] ss:$28 sps:$4 sm:$0xff]  }
 0x3ec   : > { %4955 = vmatpush3.bf16.msra.mxu1 %v5647_v12  ;;  %4096 = vmatprep.subr.bf16.mxu0 %v5650_v13  ;;  %v5722_v12 = vld [vmem:[%s7543_s7 + $0x550] ss:$28 sps:$4 sm:$0xff]  }
 0x3ed   : > { %4956 = vmatprep.subr.bf16.mxu1 %v5651_v14  ;;  %v5727_v13 = vld [vmem:[%s7543_s7 + $0x58c] ss:$28 sps:$4 sm:$0xff]  }
 0x3ee   : > { %v5725_v14 = vld [vmem:[%s7543_s7 + $0x588] ss:$28 sps:$4 sm:$0xff]  }
 0x3ef   : > { %4097 = vmatpush1.bf16.msra.mxu0 %v5648_v15  ;;  %v5730_v15 = vld [vmem:[%s7543_s7 + $0x5c4] ss:$28 sps:$4 sm:$0xff]  }
 0x3f0   : > { %4957 = vmatpush3.bf16.msra.mxu1 %v5652_v16  ;;  %4098 = vmatprep.subr.bf16.mxu0 %v5655_v17  ;;  %v5728_v16 = vld [vmem:[%s7543_s7 + $0x5c0] ss:$28 sps:$4 sm:$0xff]  }
 0x3f1   : > { %4958 = vmatprep.subr.bf16.mxu1 %v5656_v18  ;;  %v5733_v17 = vld [vmem:[%s7543_s7 + $0x5fc] ss:$28 sps:$4 sm:$0xff]  }
 0x3f2   : > { %v5731_v18 = vld [vmem:[%s7543_s7 + $0x5f8] ss:$28 sps:$4 sm:$0xff]  }
 0x3f3   : > { %4099 = vmatpush1.bf16.msra.mxu0 %v5653_v19  ;;  %v5736_v19 = vld [vmem:[%s7543_s7 + $0x634] ss:$28 sps:$4 sm:$0xff]  }
 0x3f4   : > { %4959 = vmatpush3.bf16.msra.mxu1 %v5657_v20  ;;  %4100 = vmatprep.subr.bf16.mxu0 %v5660_v21  ;;  %v5734_v20 = vld [vmem:[%s7543_s7 + $0x630] ss:$28 sps:$4 sm:$0xff]  }
 0x3f5   : > { %4966 = vmatprep.subr.bf16.mxu1 %v5661_v22  ;;  %v5739_v21 = vld [vmem:[%s7543_s7 + $0x66c] ss:$28 sps:$4 sm:$0xff]  }
 0x3f6   : > { %v5737_v22 = vld [vmem:[%s7543_s7 + $0x668] ss:$28 sps:$4 sm:$0xff]  }
 0x3f7   : > { %4203 = vmatmul.mubr.bf16.vlgmr.msra.gmra.mrb[20].mxu1 %v6935_v38  ;;  %4101 = vmatpush1.bf16.msra.mxu0 %v5658_v24  ;;  %v5742_v24 = vld [vmem:[%s7543_s7 + $0x6a4] ss:$28 sps:$4 sm:$0xff]  }
 0x3f8   : > { %4967 = vmatpush3.bf16.msra.mxu1 %v5662_v25  ;;  %4243 = vmatprep.mubr.bf16.mxu1 %v6941_v41  ;;  %v5740_v25 = vld [vmem:[%s7543_s7 + $0x6a0] ss:$28 sps:$4 sm:$0xff]  }
 0x3f9   : > { %4102 = vmatprep.subr.bf16.mxu0 %v5665_v26  ;;  %4968 = vmatprep.subr.bf16.mxu1 %v5666_v27  ;;  %v5745_v26 = vld [vmem:[%s7543_s7 + $0x6dc] ss:$28 sps:$4 sm:$0xff]  }
 0x3fa   : > { %v5743_v27 = vld [vmem:[%s7543_s7 + $0x6d8] ss:$28 sps:$4 sm:$0xff]  }
 0x3fb   : > { %4103 = vmatpush1.bf16.msra.mxu0 %v5663_v28  ;;  %v7437_v28 = vld [vmem:[%s7544_s8] sm:$0x7f] }
 0x3fc   : > { %4969 = vmatpush3.bf16.msra.mxu1 %v5667_v29  ;;  %4104 = vmatprep.subr.bf16.mxu0 %v5670_v30  ;;  %v2728_v29 = vrot.slane %v7437_v28, %v6639_v45  ;;  %v2736_v30 = vrot.slane %v7437_v28, %v6642_v46 }
 0x3fd   : > { %4970 = vmatprep.subr.bf16.mxu1 %v5671_v31  ;;  %v2732_v31 = vrot.slane %v7437_v28, %v6648_v48 }
 0x3ff   : > { %4105 = vmatpush1.bf16.msra.mxu0 %v5668_v32  ;;  %v2740_v32 = vrot.slane %v7437_v28, %v6651_v49 }
 0x400   : > { %4971 = vmatpush3.bf16.msra.mxu1 %v5672_v33  ;;  %4106 = vmatprep.subr.bf16.mxu0 %v5675_v34 }
 0x401   : > { %4972 = vmatprep.subr.bf16.mxu1 %v5676_v35 }
 0x403   : > { %4107 = vmatpush1.bf16.msra.mxu0 %v5673_v36 }
 0x404   : > { %4973 = vmatpush3.bf16.msra.mxu1 %v5677_v37  ;;  %4108 = vmatprep.subr.bf16.mxu0 %v5680_v23 }
 0x405   : > { %4974 = vmatprep.subr.bf16.mxu1 %v5681_v42 }
 0x407   : > { %4109 = vmatpush1.bf16.msra.mxu0 %v5678_v43 }
 0x408   : > { %4975 = vmatpush3.bf16.msra.mxu1 %v5682_v47  ;;  %4110 = vmatprep.subr.bf16.mxu0 %v5685_v50 }
 0x409   : > { %4976 = vmatprep.subr.bf16.mxu1 %v5686_v51 }
 0x40b   : > { %4111 = vmatpush1.bf16.msra.mxu0 %v5683_v52 }
 0x40c   : > { %4977 = vmatpush3.bf16.msra.mxu1 %v5687_v53  ;;  %4112 = vmatprep.subr.bf16.mxu0 %v5690_v54 }
 0x40d   : > { %4978 = vmatprep.subr.bf16.mxu1 %v5691_v55 }
 0x40f   : > { %4113 = vmatpush1.bf16.msra.mxu0 %v5688_v56 }
 0x410   : > { %4979 = vmatpush3.bf16.msra.mxu1 %v5692_v57  ;;  %4114 = vmatprep.subr.bf16.mxu0 %v5695_v58 }
 0x411   : > { %4980 = vmatprep.subr.bf16.mxu1 %v5696_v59 }
 0x413   : > { %4115 = vmatpush1.bf16.msra.mxu0 %v5693_v60 }
 0x414   : > { %4981 = vmatpush3.bf16.msra.mxu1 %v5697_v61  ;;  %4127 = vmatprep.subr.bf16.mxu0 %v5700_v62 }
 0x416   : > { %4117 = vmatmul.mubr.bf16.vlgmr.msra.gmra.mrb[12].mxu0 %v6935_v38  ;;  %v5709_v38 = vld [vmem:[%s7543_s7 + $0x43c] ss:$28 sps:$4 sm:$0xff]  }
 0x417   : > { %4244 = vmatmul.mubr.bf16.vlgmr.msra.gmra.mrb[24].mxu1 %v6937_v39  ;;  %4128 = vmatpush1.bf16.msra.mxu0 %v5698_v63 }
 0x418   : > { %4159 = vmatprep.mubr.bf16.mxu0 %v6941_v41  ;;  %4129 = vmatprep.subr.bf16.mxu0 %v5703_v0  ;;  %v5707_v41 = vld [vmem:[%s7543_s7 + $0x438] ss:$28 sps:$4 sm:$0xff]  }
 0x41b   : > { %4130 = vmatpush1.bf16.msra.mxu0 %v5701_v40 }
 0x41c   : > { %4131 = vmatprep.subr.bf16.mxu0 %v5706_v1 }
 0x41f   : > { %4132 = vmatpush1.bf16.msra.mxu0 %v5704_v2 }
 0x420   : > { %4133 = vmatprep.subr.bf16.mxu0 %v5709_v38 }
 0x423   : > { %4134 = vmatpush1.bf16.msra.mxu0 %v5707_v41 }
 0x424   : > { %4135 = vmatprep.subr.bf16.mxu0 %v5712_v3 }
 0x427   : > { %4136 = vmatpush1.bf16.msra.mxu0 %v5710_v4 }
 0x428   : > { %4137 = vmatprep.subr.bf16.mxu0 %v5715_v5 }
 0x42b   : > { %4138 = vmatpush1.bf16.msra.mxu0 %v5713_v6 }
 0x42c   : > { %4139 = vmatprep.subr.bf16.mxu0 %v5718_v7 }
 0x42f   : > { %4140 = vmatpush1.bf16.msra.mxu0 %v5716_v8 }
 0x430   : > { %4141 = vmatprep.subr.bf16.mxu0 %v5721_v9 }
 0x433   : > { %4142 = vmatpush1.bf16.msra.mxu0 %v5719_v10 }
 0x434   : > { %4143 = vmatprep.subr.bf16.mxu0 %v5724_v11 }
 0x437   : > { %4144 = vmatpush1.bf16.msra.mxu0 %v5722_v12 }
 0x438   : > { %4145 = vmatprep.subr.bf16.mxu0 %v5727_v13 }
 0x43b   : > { %4146 = vmatpush1.bf16.msra.mxu0 %v5725_v14 }
 0x43c   : > { %4147 = vmatprep.subr.bf16.mxu0 %v5730_v15 }
 0x43f   : > { %4148 = vmatpush1.bf16.msra.mxu0 %v5728_v16 }
 0x440   : > { %4149 = vmatprep.subr.bf16.mxu0 %v5733_v17 }
 0x443   : > { %4150 = vmatpush1.bf16.msra.mxu0 %v5731_v18 }
 0x444   : > { %4151 = vmatprep.subr.bf16.mxu0 %v5736_v19 }
 0x447   : > { %4152 = vmatpush1.bf16.msra.mxu0 %v5734_v20 }
 0x448   : > { %4153 = vmatprep.subr.bf16.mxu0 %v5739_v21 }
 0x44b   : > { %4154 = vmatpush1.bf16.msra.mxu0 %v5737_v22 }
 0x44c   : > { %4155 = vmatprep.subr.bf16.mxu0 %v5742_v24 }
 0x44f   : > { %4156 = vmatpush1.bf16.msra.mxu0 %v5740_v25 }
 0x450   : > { %4157 = vmatprep.subr.bf16.mxu0 %v5745_v26 }
 0x453   : > { %4158 = vmatpush1.bf16.msra.mxu0 %v5743_v27 }
 0x456   : > { %4160 = vmatmul.mubr.bf16.vlgmr.msra.gmra.mrb[12].mxu0 %v6937_v39 }
 0x4a9   : > { %v3989_v33 = vpop.f32.mrb[8].mxu0  ;;  %v4075_v34 = vpop.f32.mrb[16].mxu1 }
 0x4aa   : > { %v4996_v39 = vadd.f32 %v3989_v33, %v2728_v29  ;;  %v5000_v35 = vadd.f32 %v4075_v34, %v2736_v30  ;;  %v3991_v36 = vpop.f32.mrb[9].mxu0  ;;  %v4077_v37 = vpop.f32.mrb[17].mxu1  ;;  %v2751_v33 = vsub.s32 6, %v6636_v44 }
 0x4ab   : > { %v4997_v23 = vadd.f32 %v3991_v36, %v2732_v31  ;;  %v5001_v42 = vadd.f32 %v4077_v37, %v2740_v32  ;;  %v3993_v43 = vpop.f32.mrb[10].mxu0  ;;  %v4079_v47 = vpop.f32.mrb[18].mxu1 }
 0x4ac   : > { %v4252_v45 = vsub.f32 0.0, %v4996_v39  ;;  %v4254_v50 = vsub.f32 0.0, %v5000_v35  ;;  %v4998_v51 = vadd.f32 %v3993_v43, %v2728_v29  ;;  %v5002_v46 = vadd.f32 %v4079_v47, %v2736_v30  ;;  %v3995_v52 = vpop.f32.mrb[11].mxu0  ;;  %v4081_v53 = vpop.f32.mrb[19].mxu1 }
 0x4ad   : > { %v4253_v48 = vsub.f32 0.0, %v4997_v23  ;;  %v4255_v54 = vsub.f32 0.0, %v5001_v42  ;;  %v4999_v55 = vadd.f32 %v3995_v52, %v2732_v31  ;;  %v5003_v49 = vadd.f32 %v4081_v53, %v2740_v32 }
 0x4ae   : > { %v4266_v56 = vmul.f32 1.442695, %v4252_v45  ;;  %v4270_v57 = vmul.f32 1.442695, %v4254_v50  ;;  %v4259_v58 = vsub.f32 0.0, %v4998_v51  ;;  %v4261_v59 = vsub.f32 0.0, %v5002_v46 }
 0x4af   : > { %v4268_v60 = vmul.f32 1.442695, %v4253_v48  ;;  %v4272_v61 = vmul.f32 1.442695, %v4255_v54  ;;  %v4260_v62 = vsub.f32 0.0, %v4999_v55  ;;  %v4262_v63 = vsub.f32 0.0, %v5003_v49 }
 0x4b0   : > { %5746 = vpow2.f32 %v4266_v56  ;;  %v4280_v0 = vmul.f32 1.442695, %v4259_v58  ;;  %v4284_v40 = vmul.f32 1.442695, %v4261_v59  ;;  %v2752_v34 = vrot.slane %v7437_v28, %v2751_v33 }
 0x4b1   : > { %5748 = vpow2.f32 %v4270_v57  ;;  %v4282_v1 = vmul.f32 1.442695, %v4260_v62  ;;  %v4286_v2 = vmul.f32 1.442695, %v4262_v63  ;;  %v2743_v58 = vsub.s32 4, %v6636_v44 }
 0x4b2   : > { %5750 = vpow2.f32 %v4268_v60  ;;  %v2747_v59 = vsub.s32 5, %v6636_v44 }
 0x4b3   : > { %5752 = vpow2.f32 %v4272_v61  ;;  %v2744_v60 = vrot.slane %v7437_v28, %v2743_v58 }
 0x4b4   : > { %5754 = vpow2.f32 %v4280_v0  ;;  %v2748_v61 = vrot.slane %v7437_v28, %v2747_v59 }
 0x4b5   : > { %5756 = vpow2.f32 %v4284_v40 }
 0x4b6   : > { %5758 = vpow2.f32 %v4282_v1 }
 0x4b7   : > { %5760 = vpow2.f32 %v4286_v2 }
 0x4ba   : > { %v5747_v38 = vpop.eup %5746 }
 0x4bb   : > { %v5749_v41 = vpop.eup %5748  ;;  %v4294_v3 = vadd.f32 1.0, %v5747_v38 }
 0x4bc   : > { %v5751_v4 = vpop.eup %5750  ;;  %v4296_v5 = vadd.f32 1.0, %v5749_v41 }
 0x4bd   : > { %v5753_v6 = vpop.eup %5752  ;;  %5762 = vrcp.f32 %v4294_v3  ;;  %v4295_v7 = vadd.f32 1.0, %v5751_v4 }
 0x4be   : > { %v5755_v8 = vpop.eup %5754  ;;  %5764 = vrcp.f32 %v4296_v5  ;;  %v4297_v9 = vadd.f32 1.0, %v5753_v6 }
 0x4bf   : > { %v5757_v10 = vpop.eup %5756  ;;  %5766 = vrcp.f32 %v4295_v7  ;;  %v4301_v11 = vadd.f32 1.0, %v5755_v8 }
 0x4c0   : > { %v5759_v12 = vpop.eup %5758  ;;  %5768 = vrcp.f32 %v4297_v9  ;;  %v4303_v13 = vadd.f32 1.0, %v5757_v10 }
 0x4c1   : > { %v5761_v14 = vpop.eup %5760  ;;  %5770 = vrcp.f32 %v4301_v11  ;;  %v4302_v15 = vadd.f32 1.0, %v5759_v12 }
 0x4c2   : > { %5772 = vrcp.f32 %v4303_v13  ;;  %v4304_v16 = vadd.f32 1.0, %v5761_v14 }
 0x4c3   : > { %5774 = vrcp.f32 %v4302_v15 }
 0x4c4   : > { %5776 = vrcp.f32 %v4304_v16 }
 0x4c7   : > { %v5763_v17 = vpop.eup %5762 }
 0x4c8   : > { %v5765_v18 = vpop.eup %5764  ;;  %4322 = vst [vmem:[%s7449_s28] sm:$0xff] %v5763_v17 }
 0x4c9   : > { %v5767_v19 = vpop.eup %5766  ;;  %4324 = vst [vmem:[%s7449_s28 + $0x10] sm:$0xff] %v5765_v18 }
 0x4ca   : > { %v5769_v20 = vpop.eup %5768  ;;  %4323 = vst [vmem:[%s7449_s28 + $0x8] sm:$0xff] %v5767_v19  ;;  %v4960_v21 = vpop.f32.mrb[20].mxu1 }
 0x4cb   : > { %v5771_v22 = vpop.eup %5770  ;;  %4325 = vst [vmem:[%s7449_s28 + $0x18] sm:$0xff] %v5769_v20  ;;  %v4961_v24 = vpop.f32.mrb[21].mxu1 }
 0x4cc   : > { %v5773_v25 = vpop.eup %5772  ;;  %4329 = vst [vmem:[%s7449_s28 + $0x38] sm:$0xff] %v5771_v22  ;;  %v4962_v26 = vadd.f32 %v4961_v24, %v4960_v21  ;;  %v4963_v27 = vpop.f32.mrb[22].mxu1 }
 0x4cd   : > { %v5775_v29 = vpop.eup %5774  ;;  %4331 = vst [vmem:[%s7449_s28 + $0x48] sm:$0xff] %v5773_v25  ;;  %v4964_v30 = vpop.f32.mrb[23].mxu1 }
 0x4ce   : > { %v5777_v31 = vpop.eup %5776  ;;  %4330 = vst [vmem:[%s7449_s28 + $0x40] sm:$0xff] %v5775_v29  ;;  %v4965_v32 = vadd.f32 %v4964_v30, %v4963_v27  ;;  %v4205_v36 = vadd.f32 %v4962_v26, %v2752_v34 }
 0x4cf   : > { %4332 = vst [vmem:[%s7449_s28 + $0x50] sm:$0xff] %v5777_v31 }
 0x4d0   : > { %v4208_v43 = vadd.f32 %v4965_v32, %v2752_v34 }
 0x4ea   : > { %v4982_v39 = vpop.f32.mrb[24].mxu1 }
 0x4eb   : > { %v4983_v35 = vpop.f32.mrb[25].mxu1 }
 0x4ec   : > { %v4984_v37 = vadd.f32 %v4983_v35, %v4982_v39  ;;  %v4985_v23 = vpop.f32.mrb[26].mxu1 }
 0x4ed   : > { %v4986_v42 = vpop.f32.mrb[27].mxu1 }
 0x4ee   : > { %v4246_v47 = vadd.f32 %v4984_v37, %v4205_v36  ;;  %v4987_v45 = vadd.f32 %v4986_v42, %v4985_v23 }
 0x4f0   : > { %v4258_v50 = vsub.f32 0.0, %v4246_v47  ;;  %v4249_v51 = vadd.f32 %v4987_v45, %v4208_v43 }
 0x4f2   : > { %v4278_v46 = vmul.f32 1.442695, %v4258_v50  ;;  %v4265_v52 = vsub.f32 0.0, %v4249_v51 }
 0x4f4   : > { %5778 = vpow2.f32 %v4278_v46  ;;  %v4292_v53 = vmul.f32 1.442695, %v4265_v52 }
 0x4f6   : > { %5780 = vpow2.f32 %v4292_v53 }
 0x4fe   : > { %v5779_v48 = vpop.eup %5778 }
 0x4ff   : > { %v4300_v54 = vadd.f32 1.0, %v5779_v48 }
 0x500   : > { %v5781_v55 = vpop.eup %5780 }
 0x501   : > { %5782 = vrcp.f32 %v4300_v54  ;;  %v4307_v49 = vadd.f32 1.0, %v5781_v55 }
 0x503   : > { %5784 = vrcp.f32 %v4307_v49 }
 0x50b   : > { %v5783_v56 = vpop.eup %5782 }
 0x50c   : > { %4328 = vst.msk [vmem:[%s7449_s28 + $0x30] sm:$0xff] %vm1587_vm0, %v5783_v56 }
 0x50d   : > { %v5785_v57 = vpop.eup %5784 }
 0x50e   : > { %4335 = vst.msk [vmem:[%s7449_s28 + $0x68] sm:$0xff] %vm1587_vm0, %v5785_v57 }
 0x529   : > { %v4161_v62 = vpop.f32.mrb[12].mxu0 }
 0x52a   : > { %v5004_v63 = vadd.f32 %v4161_v62, %v2744_v60  ;;  %v4163_v0 = vpop.f32.mrb[13].mxu0 }
 0x52b   : > { %v5005_v40 = vadd.f32 %v4163_v0, %v2748_v61  ;;  %v4165_v1 = vpop.f32.mrb[14].mxu0 }
 0x52c   : > { %v4256_v2 = vsub.f32 0.0, %v5004_v63  ;;  %v5006_v38 = vadd.f32 %v4165_v1, %v2744_v60  ;;  %v4167_v41 = vpop.f32.mrb[15].mxu0 }
 0x52d   : > { %v4257_v3 = vsub.f32 0.0, %v5005_v40  ;;  %v5007_v4 = vadd.f32 %v4167_v41, %v2748_v61 }
 0x52e   : > { %v4274_v5 = vmul.f32 1.442695, %v4256_v2  ;;  %v4263_v6 = vsub.f32 0.0, %v5006_v38 }
 0x52f   : > { %v4276_v7 = vmul.f32 1.442695, %v4257_v3  ;;  %v4264_v8 = vsub.f32 0.0, %v5007_v4 }
 0x530   : > { %5786 = vpow2.f32 %v4274_v5  ;;  %v4288_v44 = vmul.f32 1.442695, %v4263_v6 }
 0x531   : > { %5788 = vpow2.f32 %v4276_v7  ;;  %v4290_v9 = vmul.f32 1.442695, %v4264_v8 }
 0x532   : > { %5790 = vpow2.f32 %v4288_v44 }
 0x533   : > { %5792 = vpow2.f32 %v4290_v9 }
 0x53a   : > { %v5787_v28 = vpop.eup %5786 }
 0x53b   : > { %v5789_v10 = vpop.eup %5788  ;;  %v4298_v11 = vadd.f32 1.0, %v5787_v28 }
 0x53c   : > { %v5791_v12 = vpop.eup %5790  ;;  %v4299_v13 = vadd.f32 1.0, %v5789_v10 }
 0x53d   : > { %v5793_v14 = vpop.eup %5792  ;;  %5794 = vrcp.f32 %v4298_v11  ;;  %v4305_v15 = vadd.f32 1.0, %v5791_v12 }
 0x53e   : > { %5796 = vrcp.f32 %v4299_v13  ;;  %v4306_v16 = vadd.f32 1.0, %v5793_v14 }
 0x53f   : > { %5798 = vrcp.f32 %v4305_v15 }
 0x540   : > { %5800 = vrcp.f32 %v4306_v16 }
 0x545   : > { %4343 = sbr.rel (!%p5958_p5) target bundleno = 1385 (0x569), region = 60 }
 0x547   : > { %v5795_v17 = vpop.eup %5794 }
 0x548   : > { %v5797_v18 = vpop.eup %5796  ;;  %4326 = vst [vmem:[%s7449_s28 + $0x20] sm:$0xff] %v5795_v17 }
 0x549   : > { %v5799_v19 = vpop.eup %5798  ;;  %4327 = vst [vmem:[%s7449_s28 + $0x28] sm:$0xff] %v5797_v18 }
 0x54a   : > { %v5801_v20 = vpop.eup %5800  ;;  %4333 = vst [vmem:[%s7449_s28 + $0x58] sm:$0xff] %v5799_v19 }
 0x54b   : > { %4334 = vst [vmem:[%s7449_s28 + $0x60] sm:$0xff] %v5801_v20 }
 0x54c   : > { %s7555_s29 = smov (!%p4346_p11, %s4345_s29), 2 }
 0x54d   : > { %s7480_s17 = smul.u32 896, %s7555_s29 }
 0x54f   : > { %s4351_s21 = ssub.s32 1792, %s7480_s17 }
 0x550   : > { %4352 = vsyncadd %s7475_s23, %s4351_s21  ;;  %p4894_p12 = scmp.ne.s32.totalorder %s7480_s17, 0  ;;  %s5046_s27 = smul.u32 1792, %s5941_s13 }
 0x551   : > { %s4358_s22 = sshll.u32 %s7449_s28, 4  ;;  %s5867_s26 = smov [#allocation2]   ;;  %s7492_s22 = int_to_ptr.vmem [resolvable:$true] %s4358_s22 }
 0x552   : > { %s7490_s25 = scalar_lea.hbm %s7545_s9, %s5046_s27  ;;  %s5802_s16 = scalar_lea.vmem %s7492_s22, %s7480_s17 }
 0x553   : > { %p5803_p13 = scmp.ne.s32.totalorder %s7492_s22, %s5802_s16  ;;  %s5806_s18 = sshll.u32 %s5867_s26, 4  ;;  %s5807_s18 = int_to_ptr.vmem [resolvable:$false] %s5806_s18 }
 0x554   : > { %s5808_s13 = scalar_lea.vmem %s5807_s18, 3584  ;;  %p5809_p2 = scmp.lt.s32.totalorder %s7492_s22, %s5807_s18 }
 0x555   : > { %p5804_p0 = pnand %p5803_p13, %p4894_p12  ;;  %p5810_p3 = scmp.lt.s32.totalorder %s5808_s13, %s5802_s16 }
 0x557   : > { %p5805_p1 = pneg %p5804_p0  ;;  %p5811_p4 = por %p5810_p3, %p5809_p2 }
 0x559   : > { %p5812_p5 = pnand %p5811_p4, %p5805_p1 }
 0x55b   : > { %5815 = shalt.err (!%p5812_p5)
}
 0x55c   : > { %s5816_s14 = scalar_lea.hbm %s7490_s25, %s7480_s17  ;;  %s5820_s21 = scalar_lea.hbm %s7545_s9, 6272 }
 0x55d   : > { %p5817_p7 = scmp.ne.s32.totalorder %s7490_s25, %s5816_s14  ;;  %p5821_p10 = scmp.lt.u32.totalorder %s7490_s25, %s7545_s9 }
 0x55e   : > { %p5822_p11 = scmp.lt.u32.totalorder %s5820_s21, %s5816_s14  ;;  %p5824_p0 = scmp.lt.u32.totalorder %s5816_s14, %s7490_s25 }
 0x55f   : > { %p5818_p8 = pnand %p5817_p7, %p4894_p12 }
 0x560   : > { %p5823_p13 = por %p5822_p11, %p5821_p10 }
 0x561   : > { %p5819_p9 = pneg %p5818_p8 }
 0x562   : > { %p5825_p1 = por %p5824_p0, %p5823_p13 }
 0x564   : > { %p5826_p2 = pnand %p5825_p1, %p5819_p9 }
 0x566   : > { %5829 = shalt.err (!%p5826_p2)
}
 0x567   : > { %s5868_s24 = smov 896   ;;  %s5869_s16 = smov 56  }
 0x568   : > { %4364 = dma.vmem_to_hbm [thread:$0]  (%p4894_p12), %s7492_s22, %s7480_s17, %s7490_s25, %s7475_s23, %s5868_s24, %s5868_s24, %s5869_s16  }
 0x569 PF: > { %p5052_p3 = scmp.ge.s32.totalorder %s5864_s12, 2  ;;  %s4373_s26 = sand.u32 1, %s5852_s30  }
 0x56a   : > { %s4374_s18 = scalar_lea.sflag [#allocation3], %s4373_s26 }
 0x56b   : > { %p5049_p4 = pnand %p5052_p3, %p5962_p6 }
 0x56d   : > { %5847 = dma.done.wait (!%p5049_p4), %s4374_s18, 1792  }
 0x56e   : > { %5849 = vsyncadd (!%p5049_p4), %s4374_s18, 4294965504  ;;  %s7549_s13 = sld [smem:[#allocation5_spill]]  ;;  %p19_p5 = scmp.ge.s32.totalorder %s5945_s15, 6  }
 0x56f   : > { %s7550_s30 = smov %s5856_s10  ;;  %s7551_s10 = smov %s5860_s11 }
 0x570   : > { %s7553_s12 = smov %s5945_s15  ;;  %21 = sbr.rel (!%p19_p5) target bundleno = 3 (0x3), region = 91 }
 0x574   : > { %s7552_s11 = smov %s7549_s13 }
 0x577   :  { %4379 = vsyncpa [#allocation3], 1 }
 0x578   :  { %4381 = vsyncpa [#allocation3 + $0x1], 1 }

</bundles_post_ra>
